<compile_context>
chip_gen: v7x
topology: tpu7x:2x2x1
jax: 0.10.0
libtpu: 0.0.40
codegen_flags: <defaults>
</compile_context>

<pallas_src>
import functools

import jax
import jax.numpy as jnp
from jax import lax
from jax.experimental import pallas as pl
from jax.experimental.pallas import tpu as pltpu


def _layer_norm(x, w, b, eps=1e-6):
    mean = jnp.mean(x, axis=-1, keepdims=True)
    var = jnp.mean((x - mean) ** 2, axis=-1, keepdims=True)
    return (x - mean) * lax.rsqrt(var + eps) * w + b


def _rows_to_lanes(m):
    """(R, C) -> (1, R*C) row-major lane packing so the output store is lane-dense."""
    return jnp.concatenate([m[i:i + 1, :] for i in range(m.shape[0])], axis=1)


def encoder_layer_kernel(
    x_ref,
    qf1_ref, kf2_ref, pool_ref, wg_ref, bg_ref,
    wqh_ref, wkh_ref, wvh_ref, fch_ref,
    ln1w_ref, ln1b_ref,
    w1_t_ref, b1_ref, w2_t_ref, b2_ref,
    ln2w_ref, ln2b_ref,
    out_ref, attn_ref,
    *, bb, n_head, seq_len,
):
    L = seq_len
    x = x_ref[...]                                # (bb*L, D) fp32 tokens

    # ---- FBP gate --------------------------------------------------------------------
    # qf1 = wq^T @ fbp_w1^T and kf2 = wk^T @ fbp_w2^T pre-fused in the wrapper.
    s1 = jnp.dot(x, qf1_ref[...], preferred_element_type=jnp.float32)    # (bb*L, hid*k)
    s2 = jnp.dot(x, kf2_ref[...], preferred_element_type=jnp.float32)
    fused = s1 * s2
    pooled = jnp.dot(fused, pool_ref[...], preferred_element_type=jnp.float32)  # (bb*L, hid)
    inv_norm = lax.rsqrt(jnp.maximum(
        jnp.sum(pooled * pooled, axis=-1, keepdims=True), 1e-24))
    pooled = pooled * inv_norm                    # F.normalize(dim=-1, p=2)
    gate_lin = jnp.sum(pooled * wg_ref[...], axis=-1, keepdims=True) + bg_ref[...]
    gate = jnp.where(gate_lin > 0, 1.0, 0.0)      # == (sign(tanh)+|sign(tanh)|)/2 for z != 0

    # ---- multi-head self-attention -----------------------------------------------------
    # TODO(synk): mask1/mask2 path (masked_fill_ to 1e-9 before softmax) not wired;
    #             the driver exercises the mask=None branch only.
    res_rows = []
    attn_rows = []
    for b in range(bb):                           # static unroll; sublane-aligned slices
        x_b = x[b * L:(b + 1) * L, :]             # (L, D)
        o_b = None
        a_parts = []
        for h in range(n_head):                   # head indexed on a leading (non-lane) axis
            q_h = jnp.dot(x_b, wqh_ref[h], preferred_element_type=jnp.float32)  # 1/temp folded
            k_h = jnp.dot(x_b, wkh_ref[h], preferred_element_type=jnp.float32)
            v_h = jnp.dot(x_b, wvh_ref[h], preferred_element_type=jnp.float32)
            s = jnp.dot(q_h, k_h.T, preferred_element_type=jnp.float32)          # (L, L)
            s = s - jnp.max(s, axis=-1, keepdims=True)
            e = jnp.exp(s)
            a = e * pl.reciprocal(jnp.sum(e, axis=-1, keepdims=True), approx=True)
            a_parts.append(_rows_to_lanes(a))                                     # (1, L*L)
            # fold the per-head slice of fc into the head loop -> no lane concat needed
            contrib = jnp.dot(jnp.dot(a, v_h, preferred_element_type=jnp.float32),
                              fch_ref[h], preferred_element_type=jnp.float32)     # (L, D)
            o_b = contrib if o_b is None else o_b + contrib
        res_rows.append(o_b)
        attn_rows.append(jnp.concatenate(a_parts, axis=1))                         # (1, H*L*L)

    attn_ref[:, 0, :] = jnp.concatenate(attn_rows, axis=0)                          # lane-dense store

    result = jnp.concatenate(res_rows, axis=0)                                      # (bb*L, D)
    result = result * gate + x
    result = _layer_norm(result, ln1w_ref[...], ln1b_ref[...])
    result = jnp.where(jnp.isnan(result), 0.0, result)

    # ---- position-wise feed forward -----------------------------------------------------
    hdn = jnp.maximum(
        jnp.dot(result, w1_t_ref[...], preferred_element_type=jnp.float32) + b1_ref[...],
        0.0)
    y = jnp.dot(hdn, w2_t_ref[...], preferred_element_type=jnp.float32) + b2_ref[...]
    y = y + result
    y = _layer_norm(y, ln2w_ref[...], ln2b_ref[...])
    y = jnp.where(jnp.isnan(y), 0.0, y)                                              # (bb*L, D)

    # lane-dense store: pack each batch element's (L, D) rows into one (1, L*D) row
    out_ref[:, 0, :] = jnp.concatenate(
        [_rows_to_lanes(y[b * L:(b + 1) * L, :]) for b in range(bb)], axis=0)


def encoder_layer(q, k, v, params, *, n_head, batch_block=None):
    """k, v are accepted for signature parity but are dead inputs (see header note)."""
    del k, v
    B, L, D = q.shape
    f32 = jnp.float32
    hi = jax.lax.Precision.HIGHEST

    d_k = params["wq"].shape[0]
    d_v = params["wv"].shape[0]
    dh_k, dh_v = d_k // n_head, d_v // n_head
    fbp_hid = params["wg"].shape[1]
    fbp_k = params["fbp_w1"].shape[0] // fbp_hid
    temperature = float(d_k) ** 0.5

    # Batch blocking: single-TC chips (v5e/v6e) -> whole batch in one grid step (kills
    # per-step pipeline overhead); 2-TC chips (v7x) / unknown -> one batch element per
    # step, sharded across cores via the "parallel" grid axis.
    if batch_block is None:
        batch_block = 1
        try:
            kind = jax.devices()[0].device_kind.lower()
            if any(t in kind for t in
                   ("v5e", "v5 lite", "v5lite", "v6e", "v6 lite", "v6lite")):
                batch_block = B
        except Exception:
            pass
    bb = batch_block
    assert B % bb == 0, "batch_block must divide the batch size"

    # ---- one-time weight prep (constant folding + layout plumbing, outside the kernel)
    mm = functools.partial(jnp.matmul, precision=hi)
    wq_t = params["wq"].T.astype(f32)                      # (D, d_k)
    wk_t = params["wk"].T.astype(f32)
    qf1 = mm(wq_t, params["fbp_w1"].T)                     # fold FBP fusion_1(w_q(x))
    kf2 = mm(wk_t, params["fbp_w2"].T)                     # fold FBP fusion_2(w_k(x))
    pool_mat = (jnp.arange(fbp_hid * fbp_k)[:, None] // fbp_k
                == jnp.arange(fbp_hid)[None, :]).astype(f32)   # AvgPool1d(k)*k one-hot
    wqh = (wq_t / temperature).reshape(D, n_head, dh_k).transpose(1, 0, 2)  # (H, D, dh_k)
    wkh = wk_t.reshape(D, n_head, dh_k).transpose(1, 0, 2)                  # (H, D, dh_k)
    wvh = params["wv"].T.reshape(D, n_head, dh_v).transpose(1, 0, 2)        # (H, D, dh_v)
    fch = params["fc"].T.reshape(n_head, dh_v, D)                           # (H, dh_v, D)

    weights = [
        qf1, kf2, pool_mat, params["wg"], params["bg"],
        wqh, wkh, wvh, fch,
        params["ln1_w"], params["ln1_b"],
        params["ffn_w1"].T, params["ffn_b1"],
        params["ffn_w2"].T, params["ffn_b2"],
        params["ln2_w"], params["ln2_b"],
    ]

    x_flat = q.reshape(B * L, D)
    A = n_head * L * L

    def wspec(w):
        return pl.BlockSpec(w.shape, lambda i, _nd=w.ndim: (0,) * _nd)

    kernel = functools.partial(encoder_layer_kernel, bb=bb, n_head=n_head, seq_len=L)

    out_flat, attn_flat = pl.pallas_call(
        kernel,
        out_shape=(jax.ShapeDtypeStruct((B, 1, L * D), f32),     # lane-dense slabs
                   jax.ShapeDtypeStruct((B, 1, A), f32)),
        grid=(B // bb,),
        in_specs=[pl.BlockSpec((bb * L, D), lambda i: (i, 0))]
                 + [wspec(w) for w in weights],
        out_specs=(pl.BlockSpec((bb, 1, L * D), lambda i: (i, 0, 0)),
                   pl.BlockSpec((bb, 1, A), lambda i: (i, 0, 0))),
        compiler_params=pltpu.CompilerParams(dimension_semantics=("parallel",)),
    )(x_flat, *weights)

    # TODO(synk): for large L this body materializes dense (L, L) scores per head plus a
    # dense attn output; a flash-style q-tiled rewrite (streamed / optional attn, explicit
    # vmem_limit_bytes) is needed before scaling L into the hundreds on 64 MiB-VMEM v7x.
    return out_flat.reshape(B, L, D), attn_flat.reshape(B, n_head, L, L)


# ------------------------------- pure-JAX reference -------------------------------
def reference_encoder_layer(q, params, n_head):
    p = params
    dot = functools.partial(jnp.matmul, precision=jax.lax.Precision.HIGHEST)
    B, L, D = q.shape
    d_k, d_v = p["wq"].shape[0], p["wv"].shape[0]
    dh_k, dh_v = d_k // n_head, d_v // n_head
    temp = float(d_k) ** 0.5

    qp, kp, vp = dot(q, p["wq"].T), dot(q, p["wk"].T), dot(q, p["wv"].T)

    fbp_hid = p["wg"].shape[1]
    fbp_k = p["fbp_w1"].shape[0] // fbp_hid
    fused = dot(qp, p["fbp_w1"].T) * dot(kp, p["fbp_w2"].T)
    pooled = fused.reshape(B, L, fbp_hid, fbp_k).sum(-1)
    pooled = pooled / jnp.maximum(
        jnp.linalg.norm(pooled, axis=-1, keepdims=True), 1e-12)
    gate_t = jnp.tanh(dot(pooled, p["wg"].T) + p["bg"])
    gate_sign = gate_t / jnp.abs(gate_t)
    gate = (gate_sign + jnp.abs(gate_sign)) / 2.0

    qh = qp.reshape(B, L, n_head, dh_k).transpose(0, 2, 1, 3)
    kh = kp.reshape(B, L, n_head, dh_k).transpose(0, 2, 1, 3)
    vh = vp.reshape(B, L, n_head, dh_v).transpose(0, 2, 1, 3)
    scores = dot(qh / temp, kh.transpose(0, 1, 3, 2))
    attn = jax.nn.softmax(scores, axis=-1)
    out = dot(attn, vh).transpose(0, 2, 1, 3).reshape(B, L, d_v)

    res = dot(out, p["fc"].T) * gate + q
    res = _layer_norm(res, p["ln1_w"], p["ln1_b"])
    res = jnp.where(jnp.isnan(res), 0.0, res)

    h = jax.nn.relu(dot(res, p["ffn_w1"].T) + p["ffn_b1"])
    y = dot(h, p["ffn_w2"].T) + p["ffn_b2"] + res
    y = _layer_norm(y, p["ln2_w"], p["ln2_b"])
    y = jnp.where(jnp.isnan(y), 0.0, y)
    return y, attn


def init_params(key, d_emb_q, d_k, d_inner, fbp_hid, fbp_k):
    keys = jax.random.split(key, 16)
    n = lambda i, shape, s=0.1: (s * jax.random.normal(keys[i], shape)).astype(jnp.float32)
    d_v = d_k  # slf_attn_sa: d_v = d_k
    return dict(
        wq=n(0, (d_k, d_emb_q)),
        wk=n(1, (d_k, d_emb_q)),
        wv=n(2, (d_v, d_emb_q)),
        fc=n(3, (d_emb_q, d_v)),
        fbp_w1=n(4, (fbp_hid * fbp_k, d_k)),
        fbp_w2=n(5, (fbp_hid * fbp_k, d_k)),
        wg=n(6, (1, fbp_hid)),
        bg=n(7, (1, 1)),
        ln1_w=1.0 + n(8, (1, d_emb_q)),
        ln1_b=n(9, (1, d_emb_q)),
        ffn_w1=n(10, (d_inner, d_emb_q)),
        ffn_b1=n(11, (1, d_inner)),
        ffn_w2=n(12, (d_emb_q, d_inner)),
        ffn_b2=n(13, (1, d_emb_q)),
        ln2_w=1.0 + n(14, (1, d_emb_q)),
        ln2_b=n(15, (1, d_emb_q)),
    )


if __name__ == "__main__":
    B, L = 2, 8
    n_head, d_emb_q, d_k, d_inner = 2, 32, 32, 64

    params = init_params(jax.random.PRNGKey(0), d_emb_q, d_k, d_inner,
                         fbp_hid=32, fbp_k=2)
    kq, kk, kv = jax.random.split(jax.random.PRNGKey(1), 3)
    q = jax.random.normal(kq, (B, L, d_emb_q), jnp.float32)
    k = jax.random.normal(kk, (B, L, d_emb_q), jnp.float32)  # dead input (see note)
    v = jax.random.normal(kv, (B, L, d_emb_q), jnp.float32)  # dead input (see note)

    out, attn = encoder_layer(q, k, v, params, n_head=n_head)
    jax.block_until_ready((out, attn))

    ref_out, ref_attn = reference_encoder_layer(q, params, n_head)
    assert out.shape == (B, L, d_emb_q) and attn.shape == (B, n_head, L, L)
    assert jnp.allclose(out, ref_out, atol=5e-3, rtol=5e-3)
    assert jnp.allclose(attn, ref_attn, atol=5e-3, rtol=5e-3)

    print("KERNEL_OK")
</pallas_src>

<mosaic_0001>
module attributes {stable_mosaic.version = 11 : i64} {
  func.func @encoder_layer_kernel(%arg0: i32, %arg1: memref<8x32xf32, #tpu.memory_space<vmem>>, %arg2: memref<32x64xf32, #tpu.memory_space<vmem>>, %arg3: memref<32x64xf32, #tpu.memory_space<vmem>>, %arg4: memref<64x32xf32, #tpu.memory_space<vmem>>, %arg5: memref<1x32xf32, #tpu.memory_space<vmem>>, %arg6: memref<1x1xf32, #tpu.memory_space<vmem>>, %arg7: memref<2x32x16xf32, #tpu.memory_space<vmem>>, %arg8: memref<2x32x16xf32, #tpu.memory_space<vmem>>, %arg9: memref<2x32x16xf32, #tpu.memory_space<vmem>>, %arg10: memref<2x16x32xf32, #tpu.memory_space<vmem>>, %arg11: memref<1x32xf32, #tpu.memory_space<vmem>>, %arg12: memref<1x32xf32, #tpu.memory_space<vmem>>, %arg13: memref<32x64xf32, #tpu.memory_space<vmem>>, %arg14: memref<1x64xf32, #tpu.memory_space<vmem>>, %arg15: memref<64x32xf32, #tpu.memory_space<vmem>>, %arg16: memref<1x32xf32, #tpu.memory_space<vmem>>, %arg17: memref<1x32xf32, #tpu.memory_space<vmem>>, %arg18: memref<1x32xf32, #tpu.memory_space<vmem>>, %arg19: memref<1x1x256xf32, #tpu.memory_space<vmem>>, %arg20: memref<1x1x128xf32, #tpu.memory_space<vmem>>) attributes {dimension_semantics = [#tpu.dimension_semantics<parallel>], iteration_bounds = array<i64: 2>, scalar_prefetch = 0 : i64, scratch_operands = 0 : i64, tpu.core_type = #tpu.core_type<tc>, window_params = [{transform_indices = @transform_0, window_bounds = array<i64: 8, 32>}, {pipeline_mode = #tpu.pipeline_mode<synchronous>, transform_indices = @transform_1, window_bounds = array<i64: 32, 64>}, {pipeline_mode = #tpu.pipeline_mode<synchronous>, transform_indices = @transform_2, window_bounds = array<i64: 32, 64>}, {pipeline_mode = #tpu.pipeline_mode<synchronous>, transform_indices = @transform_3, window_bounds = array<i64: 64, 32>}, {pipeline_mode = #tpu.pipeline_mode<synchronous>, transform_indices = @transform_4, window_bounds = array<i64: 1, 32>}, {pipeline_mode = #tpu.pipeline_mode<synchronous>, transform_indices = @transform_5, window_bounds = array<i64: 1, 1>}, {pipeline_mode = #tpu.pipeline_mode<synchronous>, transform_indices = @transform_6, window_bounds = array<i64: 2, 32, 16>}, {pipeline_mode = #tpu.pipeline_mode<synchronous>, transform_indices = @transform_7, window_bounds = array<i64: 2, 32, 16>}, {pipeline_mode = #tpu.pipeline_mode<synchronous>, transform_indices = @transform_8, window_bounds = array<i64: 2, 32, 16>}, {pipeline_mode = #tpu.pipeline_mode<synchronous>, transform_indices = @transform_9, window_bounds = array<i64: 2, 16, 32>}, {pipeline_mode = #tpu.pipeline_mode<synchronous>, transform_indices = @transform_10, window_bounds = array<i64: 1, 32>}, {pipeline_mode = #tpu.pipeline_mode<synchronous>, transform_indices = @transform_11, window_bounds = array<i64: 1, 32>}, {pipeline_mode = #tpu.pipeline_mode<synchronous>, transform_indices = @transform_12, window_bounds = array<i64: 32, 64>}, {pipeline_mode = #tpu.pipeline_mode<synchronous>, transform_indices = @transform_13, window_bounds = array<i64: 1, 64>}, {pipeline_mode = #tpu.pipeline_mode<synchronous>, transform_indices = @transform_14, window_bounds = array<i64: 64, 32>}, {pipeline_mode = #tpu.pipeline_mode<synchronous>, transform_indices = @transform_15, window_bounds = array<i64: 1, 32>}, {pipeline_mode = #tpu.pipeline_mode<synchronous>, transform_indices = @transform_16, window_bounds = array<i64: 1, 32>}, {pipeline_mode = #tpu.pipeline_mode<synchronous>, transform_indices = @transform_17, window_bounds = array<i64: 1, 32>}, {transform_indices = @transform_18, window_bounds = array<i64: 1, 1, 256>}, {transform_indices = @transform_19, window_bounds = array<i64: 1, 1, 128>}]} {
    %c0 = arith.constant 0 : index
    %c0_0 = arith.constant 0 : index
    %0 = vector.load %arg1[%c0, %c0_0] : memref<8x32xf32, #tpu.memory_space<vmem>>, vector<8x32xf32>
    %c0_1 = arith.constant 0 : index
    %c0_2 = arith.constant 0 : index
    %1 = vector.load %arg2[%c0_1, %c0_2] : memref<32x64xf32, #tpu.memory_space<vmem>>, vector<32x64xf32>
    %cst = arith.constant dense<0.000000e+00> : vector<8x64xf32>
    %2 = tpu.matmul %0, %1, %cst {dimension_numbers = #tpu.dot_dimension_numbers<[1], [0], [0], [1], [0, 0, 1, 1], [], []>} : vector<8x32xf32>, vector<32x64xf32>, vector<8x64xf32> -> vector<8x64xf32>
    %c0_3 = arith.constant 0 : index
    %c0_4 = arith.constant 0 : index
    %3 = vector.load %arg3[%c0_3, %c0_4] : memref<32x64xf32, #tpu.memory_space<vmem>>, vector<32x64xf32>
    %cst_5 = arith.constant dense<0.000000e+00> : vector<8x64xf32>
    %4 = tpu.matmul %0, %3, %cst_5 {dimension_numbers = #tpu.dot_dimension_numbers<[1], [0], [0], [1], [0, 0, 1, 1], [], []>} : vector<8x32xf32>, vector<32x64xf32>, vector<8x64xf32> -> vector<8x64xf32>
    %5 = arith.mulf %2, %4 : vector<8x64xf32>
    %c0_6 = arith.constant 0 : index
    %c0_7 = arith.constant 0 : index
    %6 = vector.load %arg4[%c0_6, %c0_7] : memref<64x32xf32, #tpu.memory_space<vmem>>, vector<64x32xf32>
    %cst_8 = arith.constant dense<0.000000e+00> : vector<8x32xf32>
    %7 = tpu.matmul %5, %6, %cst_8 {dimension_numbers = #tpu.dot_dimension_numbers<[1], [0], [0], [1], [0, 0, 1, 1], [], []>} : vector<8x64xf32>, vector<64x32xf32>, vector<8x32xf32> -> vector<8x32xf32>
    %8 = arith.mulf %7, %7 : vector<8x32xf32>
    %cst_9 = arith.constant dense<0.000000e+00> : vector<8xf32>
    %9 = vector.multi_reduction <add>, %8, %cst_9 [1] : vector<8x32xf32> to vector<8xf32>
    %10 = vector.shape_cast %9 : vector<8xf32> to vector<8x1xf32>
    %cst_10 = arith.constant 1.000000e-24 : f32
    %11 = vector.broadcast %cst_10 : f32 to vector<8x1xf32>
    %12 = arith.maximumf %10, %11 : vector<8x1xf32>
    %13 = math.rsqrt %12 : vector<8x1xf32>
    %14 = vector.broadcast %13 : vector<8x1xf32> to vector<8x32xf32>
    %15 = arith.mulf %7, %14 : vector<8x32xf32>
    %c0_11 = arith.constant 0 : index
    %c0_12 = arith.constant 0 : index
    %16 = vector.load %arg5[%c0_11, %c0_12] : memref<1x32xf32, #tpu.memory_space<vmem>>, vector<1x32xf32>
    %17 = vector.broadcast %16 : vector<1x32xf32> to vector<8x32xf32>
    %18 = arith.mulf %15, %17 : vector<8x32xf32>
    %cst_13 = arith.constant dense<0.000000e+00> : vector<8xf32>
    %19 = vector.multi_reduction <add>, %18, %cst_13 [1] : vector<8x32xf32> to vector<8xf32>
    %20 = vector.shape_cast %19 : vector<8xf32> to vector<8x1xf32>
    %c0_14 = arith.constant 0 : index
    %c0_15 = arith.constant 0 : index
    %21 = vector.load %arg6[%c0_14, %c0_15] : memref<1x1xf32, #tpu.memory_space<vmem>>, vector<1x1xf32>
    %22 = vector.broadcast %21 : vector<1x1xf32> to vector<8x1xf32>
    %23 = arith.addf %20, %22 : vector<8x1xf32>
    %cst_16 = arith.constant 0.000000e+00 : f32
    %24 = vector.broadcast %cst_16 : f32 to vector<8x1xf32>
    %25 = arith.cmpf ogt, %23, %24 : vector<8x1xf32>
    %cst_17 = arith.constant 1.000000e+00 : f32
    %cst_18 = arith.constant 0.000000e+00 : f32
    %26 = vector.broadcast %cst_17 : f32 to vector<8x1xf32>
    %27 = vector.broadcast %cst_18 : f32 to vector<8x1xf32>
    %28 = arith.select %25, %26, %27 : vector<8x1xi1>, vector<8x1xf32>
    %c0_19 = arith.constant 0 : index
    %c0_20 = arith.constant 0 : index
    %c0_21 = arith.constant 0 : index
    %29 = vector.load %arg7[%c0_19, %c0_20, %c0_21] : memref<2x32x16xf32, #tpu.memory_space<vmem>>, vector<1x32x16xf32>
    %30 = vector.shape_cast %29 : vector<1x32x16xf32> to vector<32x16xf32>
    %cst_22 = arith.constant dense<0.000000e+00> : vector<8x16xf32>
    %31 = tpu.matmul %0, %30, %cst_22 {dimension_numbers = #tpu.dot_dimension_numbers<[1], [0], [0], [1], [0, 0, 1, 1], [], []>} : vector<8x32xf32>, vector<32x16xf32>, vector<8x16xf32> -> vector<8x16xf32>
    %c0_23 = arith.constant 0 : index
    %c0_24 = arith.constant 0 : index
    %c0_25 = arith.constant 0 : index
    %32 = vector.load %arg8[%c0_23, %c0_24, %c0_25] : memref<2x32x16xf32, #tpu.memory_space<vmem>>, vector<1x32x16xf32>
    %33 = vector.shape_cast %32 : vector<1x32x16xf32> to vector<32x16xf32>
    %cst_26 = arith.constant dense<0.000000e+00> : vector<8x16xf32>
    %34 = tpu.matmul %0, %33, %cst_26 {dimension_numbers = #tpu.dot_dimension_numbers<[1], [0], [0], [1], [0, 0, 1, 1], [], []>} : vector<8x32xf32>, vector<32x16xf32>, vector<8x16xf32> -> vector<8x16xf32>
    %c0_27 = arith.constant 0 : index
    %c0_28 = arith.constant 0 : index
    %c0_29 = arith.constant 0 : index
    %35 = vector.load %arg9[%c0_27, %c0_28, %c0_29] : memref<2x32x16xf32, #tpu.memory_space<vmem>>, vector<1x32x16xf32>
    %36 = vector.shape_cast %35 : vector<1x32x16xf32> to vector<32x16xf32>
    %cst_30 = arith.constant dense<0.000000e+00> : vector<8x16xf32>
    %37 = tpu.matmul %0, %36, %cst_30 {dimension_numbers = #tpu.dot_dimension_numbers<[1], [0], [0], [1], [0, 0, 1, 1], [], []>} : vector<8x32xf32>, vector<32x16xf32>, vector<8x16xf32> -> vector<8x16xf32>
    %38 = tpu.transpose %34, [1, 0] : vector<8x16xf32> -> vector<16x8xf32>
    %cst_31 = arith.constant dense<0.000000e+00> : vector<8x8xf32>
    %39 = tpu.matmul %31, %38, %cst_31 {dimension_numbers = #tpu.dot_dimension_numbers<[1], [0], [0], [1], [0, 0, 1, 1], [], []>} : vector<8x16xf32>, vector<16x8xf32>, vector<8x8xf32> -> vector<8x8xf32>
    %cst_32 = arith.constant dense<0xFF800000> : vector<8xf32>
    %40 = vector.multi_reduction <maximumf>, %39, %cst_32 [1] : vector<8x8xf32> to vector<8xf32>
    %41 = vector.shape_cast %40 : vector<8xf32> to vector<8x1xf32>
    %42 = vector.broadcast %41 : vector<8x1xf32> to vector<8x8xf32>
    %43 = arith.subf %39, %42 : vector<8x8xf32>
    %44 = math.exp %43 : vector<8x8xf32>
    %cst_33 = arith.constant dense<0.000000e+00> : vector<8xf32>
    %45 = vector.multi_reduction <add>, %44, %cst_33 [1] : vector<8x8xf32> to vector<8xf32>
    %46 = vector.shape_cast %45 : vector<8xf32> to vector<8x1xf32>
    %47 = tpu.reciprocal %46 {approx = true} : vector<8x1xf32> -> vector<8x1xf32>
    %48 = vector.broadcast %47 : vector<8x1xf32> to vector<8x8xf32>
    %49 = arith.mulf %44, %48 : vector<8x8xf32>
    %50 = vector.extract_strided_slice %49 {offsets = [0, 0], sizes = [1, 8], strides = [1, 1]} : vector<8x8xf32> to vector<1x8xf32>
    %51 = vector.extract_strided_slice %49 {offsets = [1, 0], sizes = [1, 8], strides = [1, 1]} : vector<8x8xf32> to vector<1x8xf32>
    %52 = vector.extract_strided_slice %49 {offsets = [2, 0], sizes = [1, 8], strides = [1, 1]} : vector<8x8xf32> to vector<1x8xf32>
    %53 = vector.extract_strided_slice %49 {offsets = [3, 0], sizes = [1, 8], strides = [1, 1]} : vector<8x8xf32> to vector<1x8xf32>
    %54 = vector.extract_strided_slice %49 {offsets = [4, 0], sizes = [1, 8], strides = [1, 1]} : vector<8x8xf32> to vector<1x8xf32>
    %55 = vector.extract_strided_slice %49 {offsets = [5, 0], sizes = [1, 8], strides = [1, 1]} : vector<8x8xf32> to vector<1x8xf32>
    %56 = vector.extract_strided_slice %49 {offsets = [6, 0], sizes = [1, 8], strides = [1, 1]} : vector<8x8xf32> to vector<1x8xf32>
    %57 = vector.extract_strided_slice %49 {offsets = [7, 0], sizes = [1, 8], strides = [1, 1]} : vector<8x8xf32> to vector<1x8xf32>
    %58 = tpu.concatenate %50, %51, %52, %53, %54, %55, %56, %57 in 1 : vector<1x8xf32>, vector<1x8xf32>, vector<1x8xf32>, vector<1x8xf32>, vector<1x8xf32>, vector<1x8xf32>, vector<1x8xf32>, vector<1x8xf32> -> vector<1x64xf32>
    %cst_34 = arith.constant dense<0.000000e+00> : vector<8x16xf32>
    %59 = tpu.matmul %49, %37, %cst_34 {dimension_numbers = #tpu.dot_dimension_numbers<[1], [0], [0], [1], [0, 0, 1, 1], [], []>} : vector<8x8xf32>, vector<8x16xf32>, vector<8x16xf32> -> vector<8x16xf32>
    %c0_35 = arith.constant 0 : index
    %c0_36 = arith.constant 0 : index
    %c0_37 = arith.constant 0 : index
    %60 = vector.load %arg10[%c0_35, %c0_36, %c0_37] : memref<2x16x32xf32, #tpu.memory_space<vmem>>, vector<1x16x32xf32>
    %61 = vector.shape_cast %60 : vector<1x16x32xf32> to vector<16x32xf32>
    %cst_38 = arith.constant dense<0.000000e+00> : vector<8x32xf32>
    %62 = tpu.matmul %59, %61, %cst_38 {dimension_numbers = #tpu.dot_dimension_numbers<[1], [0], [0], [1], [0, 0, 1, 1], [], []>} : vector<8x16xf32>, vector<16x32xf32>, vector<8x32xf32> -> vector<8x32xf32>
    %c1 = arith.constant 1 : index
    %c0_39 = arith.constant 0 : index
    %c0_40 = arith.constant 0 : index
    %63 = vector.load %arg7[%c1, %c0_39, %c0_40] : memref<2x32x16xf32, #tpu.memory_space<vmem>>, vector<1x32x16xf32>
    %64 = vector.shape_cast %63 : vector<1x32x16xf32> to vector<32x16xf32>
    %cst_41 = arith.constant dense<0.000000e+00> : vector<8x16xf32>
    %65 = tpu.matmul %0, %64, %cst_41 {dimension_numbers = #tpu.dot_dimension_numbers<[1], [0], [0], [1], [0, 0, 1, 1], [], []>} : vector<8x32xf32>, vector<32x16xf32>, vector<8x16xf32> -> vector<8x16xf32>
    %c1_42 = arith.constant 1 : index
    %c0_43 = arith.constant 0 : index
    %c0_44 = arith.constant 0 : index
    %66 = vector.load %arg8[%c1_42, %c0_43, %c0_44] : memref<2x32x16xf32, #tpu.memory_space<vmem>>, vector<1x32x16xf32>
    %67 = vector.shape_cast %66 : vector<1x32x16xf32> to vector<32x16xf32>
    %cst_45 = arith.constant dense<0.000000e+00> : vector<8x16xf32>
    %68 = tpu.matmul %0, %67, %cst_45 {dimension_numbers = #tpu.dot_dimension_numbers<[1], [0], [0], [1], [0, 0, 1, 1], [], []>} : vector<8x32xf32>, vector<32x16xf32>, vector<8x16xf32> -> vector<8x16xf32>
    %c1_46 = arith.constant 1 : index
    %c0_47 = arith.constant 0 : index
    %c0_48 = arith.constant 0 : index
    %69 = vector.load %arg9[%c1_46, %c0_47, %c0_48] : memref<2x32x16xf32, #tpu.memory_space<vmem>>, vector<1x32x16xf32>
    %70 = vector.shape_cast %69 : vector<1x32x16xf32> to vector<32x16xf32>
    %cst_49 = arith.constant dense<0.000000e+00> : vector<8x16xf32>
    %71 = tpu.matmul %0, %70, %cst_49 {dimension_numbers = #tpu.dot_dimension_numbers<[1], [0], [0], [1], [0, 0, 1, 1], [], []>} : vector<8x32xf32>, vector<32x16xf32>, vector<8x16xf32> -> vector<8x16xf32>
    %72 = tpu.transpose %68, [1, 0] : vector<8x16xf32> -> vector<16x8xf32>
    %cst_50 = arith.constant dense<0.000000e+00> : vector<8x8xf32>
    %73 = tpu.matmul %65, %72, %cst_50 {dimension_numbers = #tpu.dot_dimension_numbers<[1], [0], [0], [1], [0, 0, 1, 1], [], []>} : vector<8x16xf32>, vector<16x8xf32>, vector<8x8xf32> -> vector<8x8xf32>
    %cst_51 = arith.constant dense<0xFF800000> : vector<8xf32>
    %74 = vector.multi_reduction <maximumf>, %73, %cst_51 [1] : vector<8x8xf32> to vector<8xf32>
    %75 = vector.shape_cast %74 : vector<8xf32> to vector<8x1xf32>
    %76 = vector.broadcast %75 : vector<8x1xf32> to vector<8x8xf32>
    %77 = arith.subf %73, %76 : vector<8x8xf32>
    %78 = math.exp %77 : vector<8x8xf32>
    %cst_52 = arith.constant dense<0.000000e+00> : vector<8xf32>
    %79 = vector.multi_reduction <add>, %78, %cst_52 [1] : vector<8x8xf32> to vector<8xf32>
    %80 = vector.shape_cast %79 : vector<8xf32> to vector<8x1xf32>
    %81 = tpu.reciprocal %80 {approx = true} : vector<8x1xf32> -> vector<8x1xf32>
    %82 = vector.broadcast %81 : vector<8x1xf32> to vector<8x8xf32>
    %83 = arith.mulf %78, %82 : vector<8x8xf32>
    %84 = vector.extract_strided_slice %83 {offsets = [0, 0], sizes = [1, 8], strides = [1, 1]} : vector<8x8xf32> to vector<1x8xf32>
    %85 = vector.extract_strided_slice %83 {offsets = [1, 0], sizes = [1, 8], strides = [1, 1]} : vector<8x8xf32> to vector<1x8xf32>
    %86 = vector.extract_strided_slice %83 {offsets = [2, 0], sizes = [1, 8], strides = [1, 1]} : vector<8x8xf32> to vector<1x8xf32>
    %87 = vector.extract_strided_slice %83 {offsets = [3, 0], sizes = [1, 8], strides = [1, 1]} : vector<8x8xf32> to vector<1x8xf32>
    %88 = vector.extract_strided_slice %83 {offsets = [4, 0], sizes = [1, 8], strides = [1, 1]} : vector<8x8xf32> to vector<1x8xf32>
    %89 = vector.extract_strided_slice %83 {offsets = [5, 0], sizes = [1, 8], strides = [1, 1]} : vector<8x8xf32> to vector<1x8xf32>
    %90 = vector.extract_strided_slice %83 {offsets = [6, 0], sizes = [1, 8], strides = [1, 1]} : vector<8x8xf32> to vector<1x8xf32>
    %91 = vector.extract_strided_slice %83 {offsets = [7, 0], sizes = [1, 8], strides = [1, 1]} : vector<8x8xf32> to vector<1x8xf32>
    %92 = tpu.concatenate %84, %85, %86, %87, %88, %89, %90, %91 in 1 : vector<1x8xf32>, vector<1x8xf32>, vector<1x8xf32>, vector<1x8xf32>, vector<1x8xf32>, vector<1x8xf32>, vector<1x8xf32>, vector<1x8xf32> -> vector<1x64xf32>
    %cst_53 = arith.constant dense<0.000000e+00> : vector<8x16xf32>
    %93 = tpu.matmul %83, %71, %cst_53 {dimension_numbers = #tpu.dot_dimension_numbers<[1], [0], [0], [1], [0, 0, 1, 1], [], []>} : vector<8x8xf32>, vector<8x16xf32>, vector<8x16xf32> -> vector<8x16xf32>
    %c1_54 = arith.constant 1 : index
    %c0_55 = arith.constant 0 : index
    %c0_56 = arith.constant 0 : index
    %94 = vector.load %arg10[%c1_54, %c0_55, %c0_56] : memref<2x16x32xf32, #tpu.memory_space<vmem>>, vector<1x16x32xf32>
    %95 = vector.shape_cast %94 : vector<1x16x32xf32> to vector<16x32xf32>
    %cst_57 = arith.constant dense<0.000000e+00> : vector<8x32xf32>
    %96 = tpu.matmul %93, %95, %cst_57 {dimension_numbers = #tpu.dot_dimension_numbers<[1], [0], [0], [1], [0, 0, 1, 1], [], []>} : vector<8x16xf32>, vector<16x32xf32>, vector<8x32xf32> -> vector<8x32xf32>
    %97 = arith.addf %62, %96 : vector<8x32xf32>
    %98 = tpu.concatenate %58, %92 in 1 : vector<1x64xf32>, vector<1x64xf32> -> vector<1x128xf32>
    %c0_58 = arith.constant 0 : index
    %c0_59 = arith.constant 0 : index
    %c0_60 = arith.constant 0 : index
    %99 = vector.load %arg20[%c0_58, %c0_59, %c0_60] : memref<1x1x128xf32, #tpu.memory_space<vmem>>, vector<1x1x128xf32>
    %100 = vector.shape_cast %99 : vector<1x1x128xf32> to vector<1x128xf32>
    %101 = vector.shape_cast %98 : vector<1x128xf32> to vector<1x1x128xf32>
    tpu.vector_store %arg20[%c0_58, %c0_59, %c0_60], %101 {strides = array<i32>} : memref<1x1x128xf32, #tpu.memory_space<vmem>>, vector<1x1x128xf32>,
    %102 = vector.broadcast %28 : vector<8x1xf32> to vector<8x32xf32>
    %103 = arith.mulf %97, %102 : vector<8x32xf32>
    %104 = arith.addf %103, %0 : vector<8x32xf32>
    %c0_61 = arith.constant 0 : index
    %c0_62 = arith.constant 0 : index
    %105 = vector.load %arg11[%c0_61, %c0_62] : memref<1x32xf32, #tpu.memory_space<vmem>>, vector<1x32xf32>
    %c0_63 = arith.constant 0 : index
    %c0_64 = arith.constant 0 : index
    %106 = vector.load %arg12[%c0_63, %c0_64] : memref<1x32xf32, #tpu.memory_space<vmem>>, vector<1x32xf32>
    %cst_65 = arith.constant dense<0.000000e+00> : vector<8xf32>
    %107 = vector.multi_reduction <add>, %104, %cst_65 [1] : vector<8x32xf32> to vector<8xf32>
    %108 = vector.shape_cast %107 : vector<8xf32> to vector<8x1xf32>
    %cst_66 = arith.constant 3.200000e+01 : f32
    %109 = vector.broadcast %cst_66 : f32 to vector<8x1xf32>
    %110 = arith.divf %108, %109 : vector<8x1xf32>
    %111 = vector.broadcast %110 : vector<8x1xf32> to vector<8x32xf32>
    %112 = arith.subf %104, %111 : vector<8x32xf32>
    %113 = arith.mulf %112, %112 : vector<8x32xf32>
    %cst_67 = arith.constant dense<0.000000e+00> : vector<8xf32>
    %114 = vector.multi_reduction <add>, %113, %cst_67 [1] : vector<8x32xf32> to vector<8xf32>
    %115 = vector.shape_cast %114 : vector<8xf32> to vector<8x1xf32>
    %cst_68 = arith.constant 3.200000e+01 : f32
    %116 = vector.broadcast %cst_68 : f32 to vector<8x1xf32>
    %117 = arith.divf %115, %116 : vector<8x1xf32>
    %118 = vector.broadcast %110 : vector<8x1xf32> to vector<8x32xf32>
    %119 = arith.subf %104, %118 : vector<8x32xf32>
    %cst_69 = arith.constant 9.99999997E-7 : f32
    %120 = vector.broadcast %cst_69 : f32 to vector<8x1xf32>
    %121 = arith.addf %117, %120 : vector<8x1xf32>
    %122 = math.rsqrt %121 : vector<8x1xf32>
    %123 = vector.broadcast %122 : vector<8x1xf32> to vector<8x32xf32>
    %124 = arith.mulf %119, %123 : vector<8x32xf32>
    %125 = vector.broadcast %105 : vector<1x32xf32> to vector<8x32xf32>
    %126 = arith.mulf %124, %125 : vector<8x32xf32>
    %127 = vector.broadcast %106 : vector<1x32xf32> to vector<8x32xf32>
    %128 = arith.addf %126, %127 : vector<8x32xf32>
    %129 = arith.cmpf one, %128, %128 : vector<8x32xf32>
    %cst_70 = arith.constant 0.000000e+00 : f32
    %130 = vector.broadcast %cst_70 : f32 to vector<8x32xf32>
    %131 = arith.select %129, %130, %128 : vector<8x32xi1>, vector<8x32xf32>
    %c0_71 = arith.constant 0 : index
    %c0_72 = arith.constant 0 : index
    %132 = vector.load %arg13[%c0_71, %c0_72] : memref<32x64xf32, #tpu.memory_space<vmem>>, vector<32x64xf32>
    %cst_73 = arith.constant dense<0.000000e+00> : vector<8x64xf32>
    %133 = tpu.matmul %131, %132, %cst_73 {dimension_numbers = #tpu.dot_dimension_numbers<[1], [0], [0], [1], [0, 0, 1, 1], [], []>} : vector<8x32xf32>, vector<32x64xf32>, vector<8x64xf32> -> vector<8x64xf32>
    %c0_74 = arith.constant 0 : index
    %c0_75 = arith.constant 0 : index
    %134 = vector.load %arg14[%c0_74, %c0_75] : memref<1x64xf32, #tpu.memory_space<vmem>>, vector<1x64xf32>
    %135 = vector.broadcast %134 : vector<1x64xf32> to vector<8x64xf32>
    %136 = arith.addf %133, %135 : vector<8x64xf32>
    %cst_76 = arith.constant 0.000000e+00 : f32
    %137 = vector.broadcast %cst_76 : f32 to vector<8x64xf32>
    %138 = arith.maximumf %136, %137 : vector<8x64xf32>
    %c0_77 = arith.constant 0 : index
    %c0_78 = arith.constant 0 : index
    %139 = vector.load %arg15[%c0_77, %c0_78] : memref<64x32xf32, #tpu.memory_space<vmem>>, vector<64x32xf32>
    %cst_79 = arith.constant dense<0.000000e+00> : vector<8x32xf32>
    %140 = tpu.matmul %138, %139, %cst_79 {dimension_numbers = #tpu.dot_dimension_numbers<[1], [0], [0], [1], [0, 0, 1, 1], [], []>} : vector<8x64xf32>, vector<64x32xf32>, vector<8x32xf32> -> vector<8x32xf32>
    %c0_80 = arith.constant 0 : index
    %c0_81 = arith.constant 0 : index
    %141 = vector.load %arg16[%c0_80, %c0_81] : memref<1x32xf32, #tpu.memory_space<vmem>>, vector<1x32xf32>
    %142 = vector.broadcast %141 : vector<1x32xf32> to vector<8x32xf32>
    %143 = arith.addf %140, %142 : vector<8x32xf32>
    %144 = arith.addf %143, %131 : vector<8x32xf32>
    %c0_82 = arith.constant 0 : index
    %c0_83 = arith.constant 0 : index
    %145 = vector.load %arg17[%c0_82, %c0_83] : memref<1x32xf32, #tpu.memory_space<vmem>>, vector<1x32xf32>
    %c0_84 = arith.constant 0 : index
    %c0_85 = arith.constant 0 : index
    %146 = vector.load %arg18[%c0_84, %c0_85] : memref<1x32xf32, #tpu.memory_space<vmem>>, vector<1x32xf32>
    %cst_86 = arith.constant dense<0.000000e+00> : vector<8xf32>
    %147 = vector.multi_reduction <add>, %144, %cst_86 [1] : vector<8x32xf32> to vector<8xf32>
    %148 = vector.shape_cast %147 : vector<8xf32> to vector<8x1xf32>
    %cst_87 = arith.constant 3.200000e+01 : f32
    %149 = vector.broadcast %cst_87 : f32 to vector<8x1xf32>
    %150 = arith.divf %148, %149 : vector<8x1xf32>
    %151 = vector.broadcast %150 : vector<8x1xf32> to vector<8x32xf32>
    %152 = arith.subf %144, %151 : vector<8x32xf32>
    %153 = arith.mulf %152, %152 : vector<8x32xf32>
    %cst_88 = arith.constant dense<0.000000e+00> : vector<8xf32>
    %154 = vector.multi_reduction <add>, %153, %cst_88 [1] : vector<8x32xf32> to vector<8xf32>
    %155 = vector.shape_cast %154 : vector<8xf32> to vector<8x1xf32>
    %cst_89 = arith.constant 3.200000e+01 : f32
    %156 = vector.broadcast %cst_89 : f32 to vector<8x1xf32>
    %157 = arith.divf %155, %156 : vector<8x1xf32>
    %158 = vector.broadcast %150 : vector<8x1xf32> to vector<8x32xf32>
    %159 = arith.subf %144, %158 : vector<8x32xf32>
    %cst_90 = arith.constant 9.99999997E-7 : f32
    %160 = vector.broadcast %cst_90 : f32 to vector<8x1xf32>
    %161 = arith.addf %157, %160 : vector<8x1xf32>
    %162 = math.rsqrt %161 : vector<8x1xf32>
    %163 = vector.broadcast %162 : vector<8x1xf32> to vector<8x32xf32>
    %164 = arith.mulf %159, %163 : vector<8x32xf32>
    %165 = vector.broadcast %145 : vector<1x32xf32> to vector<8x32xf32>
    %166 = arith.mulf %164, %165 : vector<8x32xf32>
    %167 = vector.broadcast %146 : vector<1x32xf32> to vector<8x32xf32>
    %168 = arith.addf %166, %167 : vector<8x32xf32>
    %169 = arith.cmpf one, %168, %168 : vector<8x32xf32>
    %cst_91 = arith.constant 0.000000e+00 : f32
    %170 = vector.broadcast %cst_91 : f32 to vector<8x32xf32>
    %171 = arith.select %169, %170, %168 : vector<8x32xi1>, vector<8x32xf32>
    %172 = vector.extract_strided_slice %171 {offsets = [0, 0], sizes = [1, 32], strides = [1, 1]} : vector<8x32xf32> to vector<1x32xf32>
    %173 = vector.extract_strided_slice %171 {offsets = [1, 0], sizes = [1, 32], strides = [1, 1]} : vector<8x32xf32> to vector<1x32xf32>
    %174 = vector.extract_strided_slice %171 {offsets = [2, 0], sizes = [1, 32], strides = [1, 1]} : vector<8x32xf32> to vector<1x32xf32>
    %175 = vector.extract_strided_slice %171 {offsets = [3, 0], sizes = [1, 32], strides = [1, 1]} : vector<8x32xf32> to vector<1x32xf32>
    %176 = vector.extract_strided_slice %171 {offsets = [4, 0], sizes = [1, 32], strides = [1, 1]} : vector<8x32xf32> to vector<1x32xf32>
    %177 = vector.extract_strided_slice %171 {offsets = [5, 0], sizes = [1, 32], strides = [1, 1]} : vector<8x32xf32> to vector<1x32xf32>
    %178 = vector.extract_strided_slice %171 {offsets = [6, 0], sizes = [1, 32], strides = [1, 1]} : vector<8x32xf32> to vector<1x32xf32>
    %179 = vector.extract_strided_slice %171 {offsets = [7, 0], sizes = [1, 32], strides = [1, 1]} : vector<8x32xf32> to vector<1x32xf32>
    %180 = tpu.concatenate %172, %173, %174, %175, %176, %177, %178, %179 in 1 : vector<1x32xf32>, vector<1x32xf32>, vector<1x32xf32>, vector<1x32xf32>, vector<1x32xf32>, vector<1x32xf32>, vector<1x32xf32>, vector<1x32xf32> -> vector<1x256xf32>
    %c0_92 = arith.constant 0 : index
    %c0_93 = arith.constant 0 : index
    %c0_94 = arith.constant 0 : index
    %181 = vector.load %arg19[%c0_92, %c0_93, %c0_94] : memref<1x1x256xf32, #tpu.memory_space<vmem>>, vector<1x1x256xf32>
    %182 = vector.shape_cast %181 : vector<1x1x256xf32> to vector<1x256xf32>
    %183 = vector.shape_cast %180 : vector<1x256xf32> to vector<1x1x256xf32>
    tpu.vector_store %arg19[%c0_92, %c0_93, %c0_94], %183 {strides = array<i32>} : memref<1x1x256xf32, #tpu.memory_space<vmem>>, vector<1x1x256xf32>,
    return
  }
  func.func @transform_0(%arg0: i32) -> (i32, i32) {
    %c0_i32 = arith.constant 0 : i32
    %c0_i32_0 = arith.constant 0 : i32
    return %arg0, %c0_i32 : i32, i32
  }
  func.func @transform_1(%arg0: i32) -> (i32, i32) {
    %c0_i32 = arith.constant 0 : i32
    %c0_i32_0 = arith.constant 0 : i32
    %c0_i32_1 = arith.constant 0 : i32
    return %c0_i32, %c0_i32_0 : i32, i32
  }
  func.func @transform_2(%arg0: i32) -> (i32, i32) {
    %c0_i32 = arith.constant 0 : i32
    %c0_i32_0 = arith.constant 0 : i32
    %c0_i32_1 = arith.constant 0 : i32
    return %c0_i32, %c0_i32_0 : i32, i32
  }
  func.func @transform_3(%arg0: i32) -> (i32, i32) {
    %c0_i32 = arith.constant 0 : i32
    %c0_i32_0 = arith.constant 0 : i32
    %c0_i32_1 = arith.constant 0 : i32
    return %c0_i32, %c0_i32_0 : i32, i32
  }
  func.func @transform_4(%arg0: i32) -> (i32, i32) {
    %c0_i32 = arith.constant 0 : i32
    %c0_i32_0 = arith.constant 0 : i32
    %c0_i32_1 = arith.constant 0 : i32
    return %c0_i32, %c0_i32_0 : i32, i32
  }
  func.func @transform_5(%arg0: i32) -> (i32, i32) {
    %c0_i32 = arith.constant 0 : i32
    %c0_i32_0 = arith.constant 0 : i32
    %c0_i32_1 = arith.constant 0 : i32
    return %c0_i32, %c0_i32_0 : i32, i32
  }
  func.func @transform_6(%arg0: i32) -> (i32, i32, i32) {
    %c0_i32 = arith.constant 0 : i32
    %c0_i32_0 = arith.constant 0 : i32
    %c0_i32_1 = arith.constant 0 : i32
    %c0_i32_2 = arith.constant 0 : i32
    return %c0_i32, %c0_i32_0, %c0_i32_1 : i32, i32, i32
  }
  func.func @transform_7(%arg0: i32) -> (i32, i32, i32) {
    %c0_i32 = arith.constant 0 : i32
    %c0_i32_0 = arith.constant 0 : i32
    %c0_i32_1 = arith.constant 0 : i32
    %c0_i32_2 = arith.constant 0 : i32
    return %c0_i32, %c0_i32_0, %c0_i32_1 : i32, i32, i32
  }
  func.func @transform_8(%arg0: i32) -> (i32, i32, i32) {
    %c0_i32 = arith.constant 0 : i32
    %c0_i32_0 = arith.constant 0 : i32
    %c0_i32_1 = arith.constant 0 : i32
    %c0_i32_2 = arith.constant 0 : i32
    return %c0_i32, %c0_i32_0, %c0_i32_1 : i32, i32, i32
  }
  func.func @transform_9(%arg0: i32) -> (i32, i32, i32) {
    %c0_i32 = arith.constant 0 : i32
    %c0_i32_0 = arith.constant 0 : i32
    %c0_i32_1 = arith.constant 0 : i32
    %c0_i32_2 = arith.constant 0 : i32
    return %c0_i32, %c0_i32_0, %c0_i32_1 : i32, i32, i32
  }
  func.func @transform_10(%arg0: i32) -> (i32, i32) {
    %c0_i32 = arith.constant 0 : i32
    %c0_i32_0 = arith.constant 0 : i32
    %c0_i32_1 = arith.constant 0 : i32
    return %c0_i32, %c0_i32_0 : i32, i32
  }
  func.func @transform_11(%arg0: i32) -> (i32, i32) {
    %c0_i32 = arith.constant 0 : i32
    %c0_i32_0 = arith.constant 0 : i32
    %c0_i32_1 = arith.constant 0 : i32
    return %c0_i32, %c0_i32_0 : i32, i32
  }
  func.func @transform_12(%arg0: i32) -> (i32, i32) {
    %c0_i32 = arith.constant 0 : i32
    %c0_i32_0 = arith.constant 0 : i32
    %c0_i32_1 = arith.constant 0 : i32
    return %c0_i32, %c0_i32_0 : i32, i32
  }
  func.func @transform_13(%arg0: i32) -> (i32, i32) {
    %c0_i32 = arith.constant 0 : i32
    %c0_i32_0 = arith.constant 0 : i32
    %c0_i32_1 = arith.constant 0 : i32
    return %c0_i32, %c0_i32_0 : i32, i32
  }
  func.func @transform_14(%arg0: i32) -> (i32, i32) {
    %c0_i32 = arith.constant 0 : i32
    %c0_i32_0 = arith.constant 0 : i32
    %c0_i32_1 = arith.constant 0 : i32
    return %c0_i32, %c0_i32_0 : i32, i32
  }
  func.func @transform_15(%arg0: i32) -> (i32, i32) {
    %c0_i32 = arith.constant 0 : i32
    %c0_i32_0 = arith.constant 0 : i32
    %c0_i32_1 = arith.constant 0 : i32
    return %c0_i32, %c0_i32_0 : i32, i32
  }
  func.func @transform_16(%arg0: i32) -> (i32, i32) {
    %c0_i32 = arith.constant 0 : i32
    %c0_i32_0 = arith.constant 0 : i32
    %c0_i32_1 = arith.constant 0 : i32
    return %c0_i32, %c0_i32_0 : i32, i32
  }
  func.func @transform_17(%arg0: i32) -> (i32, i32) {
    %c0_i32 = arith.constant 0 : i32
    %c0_i32_0 = arith.constant 0 : i32
    %c0_i32_1 = arith.constant 0 : i32
    return %c0_i32, %c0_i32_0 : i32, i32
  }
  func.func @transform_18(%arg0: i32) -> (i32, i32, i32) {
    %c0_i32 = arith.constant 0 : i32
    %c0_i32_0 = arith.constant 0 : i32
    %c0_i32_1 = arith.constant 0 : i32
    return %arg0, %c0_i32, %c0_i32_0 : i32, i32, i32
  }
  func.func @transform_19(%arg0: i32) -> (i32, i32, i32) {
    %c0_i32 = arith.constant 0 : i32
    %c0_i32_0 = arith.constant 0 : i32
    %c0_i32_1 = arith.constant 0 : i32
    return %arg0, %c0_i32, %c0_i32_0 : i32, i32, i32
  }
}

</mosaic_0001>

<bundles_post_ra>
// kernel: tpu_custom_call.1
= control target key start
LH: loop header
LB: loop body
LE: loop exit
PB: predicated region body
PF: predicated region fallthrough
CT: control target
= control target key end

     0   :  { %s3466_s0 = inlined_call_operand.vmem [shape: f32[16,32], index: 0, kind: input, shape index: {}]   ;;  %s3467_s1 = inlined_call_operand.vmem [shape: f32[32,64], index: 1, kind: input, shape index: {}]   ;;  %s3468_s2 = inlined_call_operand.vmem [shape: f32[32,64], index: 2, kind: input, shape index: {}]   ;;  %s3469_s3 = inlined_call_operand.vmem [shape: f32[64,32], index: 3, kind: input, shape index: {}]   ;;  %s3470_s4 = inlined_call_operand.vmem [shape: f32[1,32], index: 4, kind: input, shape index: {}]   ;;  %s3471_s5 = inlined_call_operand.<no memory space> [shape: f32[1,1], index: 5, kind: input, shape index: {}]   ;;  %s3472_s6 = inlined_call_operand.vmem [shape: f32[2,32,16], index: 6, kind: input, shape index: {}]   ;;  %s3473_s7 = inlined_call_operand.vmem [shape: f32[2,32,16], index: 7, kind: input, shape index: {}]   ;;  %s3474_s8 = inlined_call_operand.vmem [shape: f32[2,32,16], index: 8, kind: input, shape index: {}]   ;;  %s3475_s9 = inlined_call_operand.vmem [shape: f32[2,16,32], index: 9, kind: input, shape index: {}]   ;;  %s3476_s10 = inlined_call_operand.vmem [shape: f32[1,32], index: 10, kind: input, shape index: {}]   ;;  %s3477_s11 = inlined_call_operand.vmem [shape: f32[1,32], index: 11, kind: input, shape index: {}]   ;;  %s3478_s12 = inlined_call_operand.vmem [shape: f32[32,64], index: 12, kind: input, shape index: {}]   ;;  %s3479_s13 = inlined_call_operand.vmem [shape: f32[1,64], index: 13, kind: input, shape index: {}]   ;;  %s3480_s14 = inlined_call_operand.vmem [shape: f32[64,32], index: 14, kind: input, shape index: {}]   ;;  %s3481_s15 = inlined_call_operand.vmem [shape: f32[1,32], index: 15, kind: input, shape index: {}]   ;;  %s3482_s16 = inlined_call_operand.vmem [shape: f32[1,32], index: 16, kind: input, shape index: {}]   ;;  %s3483_s17 = inlined_call_operand.vmem [shape: f32[1,32], index: 17, kind: input, shape index: {}]   ;;  %s3484_s18 = inlined_call_operand.hbm [shape: f32[2,1,256], index: 18, kind: output, shape index: {0}]   ;;  %s3485_s19 = inlined_call_operand.hbm [shape: f32[2,1,128], index: 19, kind: output, shape index: {1}]  }
   0x1   :  { %3504 = sst [smem:[#allocation17_spill]] %s3466_s0  ;;  %v25_v0 = vstv %s3471_s5 }
   0x2   :  { %3505 = sst [smem:[#allocation18_spill]] %s3467_s1  ;;  %26 = vst [vmem:[#allocation2] sm:$0x1] %v25_v0 }
   0x3   :  { %3506 = sst [smem:[#allocation19_spill]] %s3468_s2 }
   0x4   :  { %3507 = sst [smem:[#allocation20_spill]] %s3469_s3 }
   0x5   :  { %3508 = sst [smem:[#allocation21_spill]] %s3470_s4 }
   0x6   :  { %3509 = sst [smem:[#allocation22_spill]] %s3484_s18 }
   0x7   :  { %3510 = sst [smem:[#allocation23_spill]] %s3485_s19 }
   0x8   :  { %27 = vsyncpa [#allocation4], 0 }
   0x9   :  { %29 = vsyncpa [#allocation4 + $0x1], 0 }
   0xa   :  { %30 = vsyncpa [#allocation6], 0 }
   0xb   :  { %32 = vsyncpa [#allocation6 + $0x1], 0  ;;  %s2970_s20 = smov 0   ;;  %s2972_s21 = smov 0  }
   0xc   :  { %s2974_s1 = smov 0   ;;  %s2976_s22 = smov 0  }
   0xd LB: > { %3511 = sst [smem:[#allocation9_spill]] %s2837_s20  ;;  %s2991_s5 = sadd.s32 4294967295, %s2849_s22   ;;  %s2849_s22 = sphi %s2976_s22, %s3535_s22   ;;  %s2845_s1 = sphi %s2974_s1, %s3537_s1   ;;  %s2841_s21 = sphi %s2972_s21, %s3539_s21   ;;  %s2837_s20 = sphi %s2970_s20, %s3538_s20  }
   0xe   : > { %3512 = sst [smem:[#allocation10_spill]] %s2845_s1  ;;  %s2294_s2 = sadd.s32 4294967294, %s2849_s22  }
   0xf   : > { %3513 = sst [smem:[#allocation11_spill]] %s2849_s22  ;;  %s2995_s23 = sadd.s32 1, %s2849_s22  }
  0x10   : > { %3514 = sst [smem:[#allocation12_spill]] %s2991_s5  ;;  %s428_s24 = sadd.s32 1, %s2845_s1 }
  0x11   : > { %3515 = sst [smem:[#allocation13_spill]] %s2995_s23  ;;  %s425_s25 = ssub.s32 %s2849_s22, %s2995_s23 }
  0x12   : > { %p438_p0 = scmp.ne.s32.totalorder %s2845_s1, %s2841_s21  ;;  %p426_p1 = scmp.eq.s32.totalorder %s425_s25, 0 }
  0x13   : > { %p439_p2 = scmp.eq.s32.totalorder %s2991_s5, 1  ;;  %p444_p3 = scmp.ne.s32.totalorder %s2841_s21, %s2837_s20 }
  0x14   : > { %p445_p4 = scmp.eq.s32.totalorder %s2294_s2, 1  ;;  %p2297_p7 = scmp.ge.s32.totalorder %s2849_s22, 1 }
  0x15   : > { %s3006_s3 = scalar_select %p426_p1, %s2845_s1, %s428_s24  }
  0x16   : > { %p3008_p5 = por %p439_p2, %p438_p0  ;;  %p3012_p6 = por %p445_p4, %p444_p3 }
  0x17   : > { %3516 = sst [smem:[#allocation14_spill]] %s3006_s3  ;;  %p547_p8 = scmp.lt.s32.totalorder %s2849_s22, 3 }
  0x18   : > { %s3517_s26 = scalar_select %p3008_p5, 1, 0 }
  0x19   : > { %s3519_s27 = scalar_select %p3012_p6, 1, 0 }
  0x1a   : > { %3518 = sst [smem:[#allocation15_spill]] %s3517_s26  ;;  %p548_p9 = pnand %p2297_p7, %p547_p8 }
  0x1b   : > { %3520 = sst [smem:[#allocation16_spill]] %s3519_s27  ;;  %s3521_s0 = sld [smem:[#allocation18_spill]] (!%p548_p9)  ;;  %v2851_v4 = vmov (!%p548_p9), 0.0|0.0   ;;  %vm2852_vm0 = vmmov (!%p548_p9), 0   ;;  %v2853_v7 = vmov (!%p548_p9), 0.0   ;;  %vm615_vm1 = vcmask (!%p548_p9), 261120  }
  0x1c   : > { %551 = sbr.rel (%p548_p9) target bundleno = 3225 (0xc99), region = 92  ;;  %2596 = vmatprep.subr.bf16.mxu1 (!%p548_p9), %v2851_v4  ;;  %2433 = vmatprep.mubr.msk.f32.mxu1 (!%p548_p9), %vm2852_vm0, %v2853_v7  ;;  %p606_p10 = scmp.lt.s32.totalorder (!%p548_p9), %s2991_s5, 1  ;;  %v874_v19 = vld [vmem:[%s3472_s6] sm:$0xff] (!%p548_p9)  ;;  %v875_v20 = vld [vmem:[%s3472_s6 + $0x8] sm:$0xff] (!%p548_p9)  ;;  %v876_v22 = vld [vmem:[%s3472_s6 + $0x10] sm:$0xff] (!%p548_p9)  ;;  %vm772_vm2 = vcmask (!%p548_p9), 523264  }
  0x1d   : > { %2608 = vmatprep.subr.bf16.mxu0 (!%p548_p9), %v2851_v4  ;;  %2463 = vmatprep.mubr.msk.f32.mxu0 (!%p548_p9), %vm2852_vm0, %v2853_v7  ;;  %s3522_s1 = sld [smem:[#allocation19_spill]] (!%p548_p9)  ;;  %s3524_s27 = sld [smem:[#allocation20_spill]] (!%p548_p9)  ;;  %v2621_v21 = vpack.c.bf16 (!%p548_p9), %v875_v20, %v874_v19  ;;  %v877_v23 = vld [vmem:[%s3472_s6 + $0x18] sm:$0xff] (!%p548_p9)  ;;  %v948_v25 = vld [vmem:[%s3473_s7] sm:$0xff] (!%p548_p9)  ;;  %v949_v26 = vld [vmem:[%s3473_s7 + $0x8] sm:$0xff] (!%p548_p9)  ;;  %vm1096_vm3 = vcmask (!%p548_p9), 130048  }
  0x1e   : > { %s3525_s26 = sld [smem:[#allocation17_spill]] (!%p548_p9)  ;;  %v2624_v24 = vpack.c.bf16 (!%p548_p9), %v877_v23, %v876_v22  ;;  %v2627_v27 = vpack.c.bf16 (!%p548_p9), %v949_v26, %v948_v25  ;;  %v950_v28 = vld [vmem:[%s3473_s7 + $0x10] sm:$0xff] (!%p548_p9)  ;;  %v951_v29 = vld [vmem:[%s3473_s7 + $0x18] sm:$0xff] (!%p548_p9)  ;;  %v1022_v49 = vld [vmem:[%s3474_s8] sm:$0xff] (!%p548_p9)  ;;  %vm1173_vm4 = vcmask (!%p548_p9), 64512   ;;  %s3526_s4 = sld [smem:[#allocation21_spill]] (!%p548_p9) }
  0x1f   : > { %v2630_v30 = vpack.c.bf16 (!%p548_p9), %v951_v29, %v950_v28  ;;  %v1023_v50 = vld [vmem:[%s3474_s8 + $0x8] sm:$0xff] (!%p548_p9)  ;;  %v1024_v51 = vld [vmem:[%s3474_s8 + $0x10] sm:$0xff] (!%p548_p9)  ;;  %v1025_v53 = vld [vmem:[%s3474_s8 + $0x18] sm:$0xff] (!%p548_p9)  ;;  %s2855_s20 = smov (!%p548_p9), 40   ;;  %s2856_s22 = smov (!%p548_p9), 56   ;;  %vm1216_vm8 = vcmask (!%p548_p9), 195584  }
  0x20   : > { %v2633_v52 = vpack.c.bf16 (!%p548_p9), %v1023_v50, %v1022_v49  ;;  %v2636_v54 = vpack.c.bf16 (!%p548_p9), %v1025_v53, %v1024_v51  ;;  %v2318_v20 = vld [vmem:[%s3473_s7 + $0x30] sm:$0xff] (!%p548_p9)  ;;  %v2321_v29 = vld [vmem:[%s3474_s8 + $0x20] sm:$0xff] (!%p548_p9)  ;;  %v2854_v50 = vmov (!%p548_p9), 0   ;;  %s2858_s24 = smov (!%p548_p9), 32   ;;  %s2859_s23 = smov (!%p548_p9), 8   ;;  %vm1219_vm9 = vcmask (!%p548_p9), 326656  }
  0x21   : > { %v611_v1 = vld [vmem:[%s3521_s0] sm:$0xff] (!%p548_p9)  ;;  %v612_v2 = vld [vmem:[%s3521_s0 + $0x8] sm:$0xff] (!%p548_p9)  ;;  %v613_v3 = vld [vmem:[%s3521_s0 + $0x10] sm:$0xff] (!%p548_p9)  ;;  %2740 = vset.pattern.permute.xlu0 (!%p548_p9), %v2854_v50  ;;  %s2861_s18 = smov (!%p548_p9), 48   ;;  %vm1221_vm10 = vcmask (!%p548_p9), 392192   ;;  %vm1223_vm11 = vcmask (!%p548_p9), 457728  }
  0x22   : > { %v2597_v5 = vpack.c.bf16 (!%p548_p9), %v612_v2, %v611_v1  ;;  %v614_v6 = vld [vmem:[%s3521_s0 + $0x18] sm:$0xff] (!%p548_p9)  ;;  %s2860_s0 = smov (!%p548_p9), 24   ;;  %vm2147_vm12 = vcmask (!%p548_p9), 785408   ;;  %s3529_s30 = sld [smem:[#allocation22_spill]] (!%p548_p9) }
  0x23   : > { %v2600_v8 = vpack.c.bf16 %v614_v6, %v613_v3  ;;  %s607_s28 = scalar_select %p606_p10, %s2991_s5, 1  ;;  %v689_v9 = vld [vmem:[%s3522_s1] sm:$0xff]  ;;  %v765_v12 = vld [vmem:[%s3524_s27 + $0x8] sm:$0xff]  ;;  %v766_v31 = vld [vmem:[%s3524_s27 + $0x10] sm:$0xff] }
  0x24   : > { %2598 = vmatpush3.bf16.msra.mxu1 %v2597_v5  ;;  %s3523_s3 = smov %s3522_s1  ;;  %v764_v11 = vld [vmem:[%s3524_s27] sm:$0xff]  ;;  %v767_v32 = vld [vmem:[%s3524_s27 + $0x18] sm:$0xff]  ;;  %v769_v35 = vld [vmem:[%s3524_s27 + $0x28] sm:$0xff]  ;;  %s2862_s1 = smov 64  }
  0x25   : > { %2599 = vmatprep.subr.bf16.mxu1 %v2851_v4  ;;  %v690_v10 = vld [vmem:[%s3523_s3 + $0x8] sm:$0xff]  ;;  %s2299_s25 = sshll.u32 %s607_s28, 3  ;;  %v2609_v13 = vpack.c.bf16 %v765_v12, %v764_v11  ;;  %v691_v16 = vld [vmem:[%s3523_s3 + $0x10] sm:$0xff]  ;;  %v692_v17 = vld [vmem:[%s3523_s3 + $0x18] sm:$0xff]  ;;  %v2612_v33 = vpack.c.bf16 %v767_v32, %v766_v31 }
  0x26   : > { %s609_s5 = scalar_lea.vmem %s3525_s26, %s2299_s25  ;;  %v2603_v15 = vpack.c.bf16 %v690_v10, %v689_v9  ;;  %v2606_v18 = vpack.c.bf16 %v692_v17, %v691_v16  ;;  %v768_v34 = vld [vmem:[%s3524_s27 + $0x20] sm:$0xff]  ;;  %v770_v37 = vld [vmem:[%s3524_s27 + $0x30] sm:$0xff]  ;;  %v771_v38 = vld [vmem:[%s3524_s27 + $0x38] sm:$0xff]  ;;  %s2865_s26 = smov [#allocation3]  }
  0x27   : > { %v3054_v14 = vld [vmem:[%s609_s5] sm:$0xff]  ;;  %2610 = vmatpush3.bf16.msra.mxu0 %v2609_v13  ;;  %v2615_v36 = vpack.c.bf16 %v769_v35, %v768_v34  ;;  %v2618_v39 = vpack.c.bf16 %v771_v38, %v770_v37  ;;  %v2313_v10 = vld [vmem:[%s3472_s6 + $0x30] sm:$0xff]  ;;  %v2314_v11 = vld [vmem:[%s3472_s6 + $0x38] sm:$0xff]  ;;  %s2857_s5 = smov 16   ;;  %s2759_s3 = sshll.u32 %s2865_s26, 4  ;;  %s2760_s3 = int_to_ptr.vmem [resolvable:$false] %s2759_s3 }
  0x28   : > { %2601 = vmatpush3.bf16.msra.mxu1 %v2600_v8  ;;  %2611 = vmatprep.subr.bf16.mxu0 %v2851_v4  ;;  %v2311_v6 = vld [vmem:[%s3472_s6 + $0x20] sm:$0xff]  ;;  %v2312_v8 = vld [vmem:[%s3472_s6 + $0x28] sm:$0xff]  ;;  %v2642_v12 = vpack.c.bf16 %v2314_v11, %v2313_v10  ;;  %v2323_v31 = vld [vmem:[%s3474_s8 + $0x30] sm:$0xff] }
  0x29   : > { %2602 = vmatprep.subr.bf16.mxu1 %v2851_v4  ;;  %v2639_v9 = vpack.c.bf16 %v2312_v8, %v2311_v6  ;;  %v2317_v16 = vld [vmem:[%s3473_s7 + $0x28] sm:$0xff] }
  0x2b   : > { %2434 = vmatmul.mubr.msk.f32.vlgmr.msra.gmra.mrb[0].mxu1 %vm615_vm1, %v3054_v14  ;;  %2613 = vmatpush3.bf16.msra.mxu0 %v2612_v33  ;;  %v2324_v33 = vld [vmem:[%s3474_s8 + $0x38] sm:$0xff] }
  0x2c   : > { %2604 = vmatpush3.bf16.msra.mxu1 %v2603_v15  ;;  %2444 = vmatprep.mubr.msk.f32.mxu1 %vm2852_vm0, %v2853_v7  ;;  %v2316_v15 = vld [vmem:[%s3473_s7 + $0x20] sm:$0xff]  ;;  %v2654_v34 = vpack.c.bf16 %v2324_v33, %v2323_v31  ;;  %v2001_v31 = vld [vmem:[%s3480_s14 + $0x18] sm:$0xff] }
  0x2d   : > { %2605 = vmatprep.subr.bf16.mxu1 %v2851_v4  ;;  %2614 = vmatprep.subr.bf16.mxu0 %v2851_v4  ;;  %v2002_v33 = vld [vmem:[%s3480_s14 + $0x20] sm:$0xff] }
  0x2f   : > { %2616 = vmatpush3.bf16.msra.mxu0 %v2615_v36 }
  0x30   : > { %2607 = vmatpush3.bf16.msra.mxu1 %v2606_v18  ;;  %2617 = vmatprep.subr.bf16.mxu0 %v2851_v4  ;;  %v2645_v18 = vpack.c.bf16 %v2317_v16, %v2316_v15 }
  0x31   : > { %2620 = vmatprep.subr.bf16.mxu1 %v2851_v4 }
  0x33   : > { %2445 = vmatmul.mubr.msk.f32.vlgmr.msra.gmra.mrb[2].mxu1 %vm615_vm1, %v3054_v14  ;;  %2619 = vmatpush3.bf16.msra.mxu0 %v2618_v39 }
  0x34   : > { %2622 = vmatpush3.bf16.msra.mxu1 %v2621_v21  ;;  %2474 = vmatprep.mubr.msk.f32.mxu1 %vm2852_vm0, %v2853_v7  ;;  %v2319_v21 = vld [vmem:[%s3473_s7 + $0x38] sm:$0xff] }
  0x35   : > { %2623 = vmatprep.subr.bf16.mxu1 %v2851_v4  ;;  %2632 = vmatprep.subr.bf16.mxu0 %v2851_v4  ;;  %v2648_v22 = vpack.c.bf16 %v2319_v21, %v2318_v20 }
  0x38   : > { %2625 = vmatpush3.bf16.msra.mxu1 %v2624_v24 }
  0x39   : > { %2626 = vmatprep.subr.bf16.mxu1 %v2851_v4 }
  0x3b   : > { %2475 = vmatmul.mubr.msk.f32.vlgmr.msra.gmra.mrb[4].mxu1 %vm615_vm1, %v3054_v14 }
  0x3c   : > { %2628 = vmatpush3.bf16.msra.mxu1 %v2627_v27  ;;  %2485 = vmatprep.mubr.msk.f32.mxu1 %vm2852_vm0, %v2853_v7 }
  0x3d   : > { %2629 = vmatprep.subr.bf16.mxu1 %v2851_v4 }
  0x40   : > { %2631 = vmatpush3.bf16.msra.mxu1 %v2630_v30  ;;  %v2322_v30 = vld [vmem:[%s3474_s8 + $0x28] sm:$0xff] }
  0x41   : > { %2499 = vmatprep.subr.mxu1 %v2853_v7  ;;  %v2651_v32 = vpack.c.bf16 %v2322_v30, %v2321_v29  ;;  %v2000_v29 = vld [vmem:[%s3480_s14 + $0x10] sm:$0xff] }
  0x43   : > { %2486 = vmatmul.mubr.msk.f32.vlgmr.msra.gmra.mrb[6].mxu1 %vm615_vm1, %v3054_v14 }
  0x44   : > { %2501 = vmatprep.mubr.msk.f32.mxu1 %vm2852_vm0, %v2853_v7 }
  0xfe   : > { %v685_v40 = vpop.f32.mrb[0].mxu1 }
  0xff   : > { %v2435_v41 = vpop.f32.mrb[1].mxu1 }
 0x106   : > { %v759_v42 = vpop.f32.mrb[2].mxu1 }
 0x107   : > { %v763_v43 = vmul.f32 %v759_v42, %v685_v40  ;;  %v2446_v44 = vpop.f32.mrb[3].mxu1 }
 0x109   : > { %2464 = vmatmul.mubr.msk.f32.vlgmr.msra.gmra.mrb[0].mxu0 %vm772_vm2, %v763_v43 }
 0x10a   : > { %2496 = vmatprep.mubr.msk.f32.mxu0 %vm2852_vm0, %v2853_v7  ;;  %2634 = vmatpush3.bf16.msra.mxu0 %v2633_v52 }
 0x10b   : > { %2635 = vmatprep.subr.bf16.mxu0 %v2851_v4 }
 0x10e   : > { %v944_v45 = vpop.f32.mrb[4].mxu1  ;;  %2637 = vmatpush3.bf16.msra.mxu0 %v2636_v54  ;;  %v2304_v54 = vld [vmem:[#allocation2] ss:$0 sm:$0xff] }
 0x10f   : > { %v2476_v46 = vpop.f32.mrb[5].mxu1  ;;  %2638 = vmatprep.subr.bf16.mxu0 %v2851_v4 }
 0x111   : > { %2497 = vmatmul.mubr.msk.f32.vlgmr.msra.gmra.mrb[2].mxu0 %vm615_vm1, %v3054_v14 }
 0x112   : > { %2517 = vmatprep.mubr.msk.f32.mxu0 %vm2852_vm0, %v2853_v7  ;;  %2640 = vmatpush3.bf16.msra.mxu0 %v2639_v9 }
 0x113   : > { %2641 = vmatprep.subr.bf16.mxu0 %v2851_v4 }
 0x116   : > { %v1018_v47 = vpop.f32.mrb[6].mxu1  ;;  %2643 = vmatpush3.bf16.msra.mxu0 %v2642_v12 }
 0x117   : > { %v2487_v48 = vpop.f32.mrb[7].mxu1  ;;  %2500 = vmatpush3.xpose.msk.msra.mxu1 %vm1096_vm3, %v1018_v47  ;;  %2650 = vmatprep.subr.bf16.mxu0 %v2851_v4 }
 0x118   : > { %2504 = vmatprep.subr.mxu1 %v2853_v7 }
 0x119   : > { %2518 = vmatmul.mubr.msk.f32.vlgmr.msra.gmra.mrb[4].mxu0 %vm615_vm1, %v3054_v14 }
 0x11a   : > { %2502 = vmatmul.mubr.msk.f32.vlgmr.msra.gmra.mrb[8].mxu1 %vm1096_vm3, %v944_v45  ;;  %2539 = vmatprep.mubr.msk.f32.mxu0 %vm2852_vm0, %v2853_v7  ;;  %v2303_v45 = vld [vmem:[%s3526_s4] ss:$0 sm:$0xff]  ;;  %s2761_s4 = scalar_lea.vmem %s2760_s3, 64 }
 0x11b   : > { %2506 = vmatprep.mubr.msk.f32.mxu1 %vm2852_vm0, %v2853_v7  ;;  %2652 = vmatpush3.bf16.msra.mxu0 %v2651_v32  ;;  %v2672_v32 = vpack.c.bf16 %v2001_v31, %v2000_v29 }
 0x11c   : > { %2653 = vmatprep.subr.bf16.mxu0 %v2851_v4 }
 0x11f   : > { %2655 = vmatpush3.bf16.msra.mxu0 %v2654_v34  ;;  %v2003_v34 = vld [vmem:[%s3480_s14 + $0x28] sm:$0xff] }
 0x120   : > { %2656 = vmatprep.subr.bf16.mxu0 %v2851_v4 }
 0x122   : > { %2540 = vmatmul.mubr.msk.f32.vlgmr.msra.gmra.mrb[6].mxu0 %vm615_vm1, %v3054_v14 }
 0x123   : > { %2556 = vmatprep.mubr.msk.f32.mxu0 %vm2852_vm0, %v2853_v7 }
 0x1dc   : > { %v3157_v55 = vpop.f32.mrb[0].mxu0 }
 0x1dd   : > { %v2465_v56 = vpop.f32.mrb[1].mxu0  ;;  %v846_v0 = vmul.f32 %v3157_v55, %v3157_v55 }
 0x1df   : > { %v847_v2 = vsel %vm615_vm1, %v846_v0, 0.0  ;;  %v2330_v0 = vld [vmem:[%s3475_s9 + $0x18] sm:$0xff] }
 0x1e4   : > { %v1092_v3 = vpop.f32.mrb[2].mxu0 }
 0x1e5   : > { %v2498_v5 = vpop.f32.mrb[3].mxu0  ;;  %2505 = vmatpush3.msra.mxu1 %v1092_v3  ;;  %v1297_v3 = vld [vmem:[%s3475_s9] sm:$0xff] }
 0x1e6   : > { %2644 = vmatprep.subr.bf16.mxu1 %v2851_v4  ;;  %v1298_v5 = vld [vmem:[%s3475_s9 + $0x8] sm:$0xff] }
 0x1e7   : > { %v2660_v6 = vpack.c.bf16 %v1298_v5, %v1297_v3 }
 0x1ec   : > { %v1370_v23 = vpop.f32.mrb[4].mxu0 }
 0x1ed   : > { %v1169_v57 = vpop.f32.mrb[8].mxu1  ;;  %v2519_v24 = vpop.f32.mrb[5].mxu0 }
 0x1ee   : > { %v2503_v58 = vpop.f32.mrb[9].mxu1  ;;  %v1174_v59 = vsel %vm1173_vm4, %v1169_v57, -inf }
 0x1ef   : > { %1175 = vmax.xlane.f32.xlu0 %v1174_v59 }
 0x1f5   : > { %v1520_v51 = vpop.f32.mrb[6].mxu0 }
 0x1f6   : > { %v2541_v52 = vpop.f32.mrb[7].mxu0 }
 0x27c   : > { %v1176_v60 = vpop.xlane.xlu0 %1175 }
 0x27d   : > { %v1177_v61 = vsub.f32 %v1169_v57, %v1176_v60 }
 0x27f   : > { %v1178_v62 = vmul.f32 1.442695, %v1177_v61 }
 0x281   : > { %2741 = vpow2.f32 %v1178_v62 }
 0x28b   : > { %v2742_v63 = vpop.eup %2741 }
 0x28c   : > { %v1180_v1 = vsel %vm1173_vm4, %v2742_v63, 0.0 }
 0x28d   : > { %1181 = vadd.xlane.f32.xlu0 %v1180_v1 }
 0x291   : > { %848 = vadd.xlane.f32.xlu0 %v847_v2 }
 0x31a   : > { %v1182_v13 = vpop.xlane.xlu0 %1181 }
 0x31b   : > { %2743 = vrcp.f32 %v1182_v13 }
 0x31e   : > { %v849_v38 = vpop.xlane.xlu0 %848 }
 0x31f   : > { %v850_v39 = vmax.f32 %v849_v38, 1e-24 }
 0x321   : > { %2745 = vrsqrt.f32 %v850_v39 }
 0x325   : > { %v2744_v17 = vpop.eup %2743 }
 0x326   : > { %v3189_v19 = vmul.f32 %v2744_v17, %v2742_v63  ;;  %v2329_v63 = vld [vmem:[%s3475_s9 + $0x10] sm:$0xff] }
 0x327   : > { %v2657_v1 = vpack.c.bf16 %v2330_v0, %v2329_v63 }
 0x328   : > { %2507 = vmatmul.mubr.msk.f32.vlgmr.msra.gmra.mrb[10].mxu1 %vm1173_vm4, %v3189_v19  ;;  %v1190_v62 = vrot.slane %v3189_v19, 2  ;;  %v1198_v2 = vrot.slane %v3189_v19, 4 }
 0x329   : > { %2646 = vmatpush3.bf16.msra.mxu1 %v2645_v18  ;;  %2528 = vmatprep.mubr.msk.f32.mxu1 %vm2852_vm0, %v2853_v7 }
 0x32a   : > { %2647 = vmatprep.subr.bf16.mxu1 %v2851_v4  ;;  %2658 = vmatpush3.bf16.msra.mxu0 %v2657_v1 }
 0x32b   : > { %v2746_v43 = vpop.eup %2745  ;;  %2659 = vmatprep.subr.bf16.mxu0 %v2851_v4 }
 0x32c   : > { %v852_v44 = vmul.f32 %v2746_v43, %v3157_v55 }
 0x32d   : > { %2649 = vmatpush3.bf16.msra.mxu1 %v2648_v22 }
 0x32e   : > { %2542 = vmatprep.subr.mxu1 %v2853_v7  ;;  %v860_v48 = vmul.f32 %v2303_v45, %v852_v44 }
 0x330   : > { %2529 = vmatmul.mubr.msk.f32.vlgmr.msra.gmra.mrb[12].mxu1 %vm615_vm1, %v3054_v14  ;;  %v861_v49 = vsel %vm615_vm1, %v860_v48, 0.0  ;;  %v2335_v48 = vld [vmem:[%s3479_s13] ss:$0 sm:$0xff] }
 0x331   : > { %2544 = vmatprep.mubr.msk.f32.mxu1 %vm2852_vm0, %v2853_v7 }
 0x3fb   : > { %v3207_v25 = vpop.f32.mrb[10].mxu1 }
 0x3fc   : > { %v2508_v26 = vpop.f32.mrb[11].mxu1 }
 0x403   : > { %v1445_v27 = vpop.f32.mrb[12].mxu1 }
 0x404   : > { %v2530_v28 = vpop.f32.mrb[13].mxu1  ;;  %2543 = vmatpush3.xpose.msk.msra.mxu1 %vm1096_vm3, %v1445_v27  ;;  %v1998_v27 = vld [vmem:[%s3480_s14] sm:$0xff] }
 0x405   : > { %2547 = vmatprep.subr.mxu1 %v2853_v7  ;;  %v1999_v28 = vld [vmem:[%s3480_s14 + $0x8] sm:$0xff] }
 0x406   : > { %v2669_v30 = vpack.c.bf16 %v1999_v28, %v1998_v27 }
 0x407   : > { %2545 = vmatmul.mubr.msk.f32.vlgmr.msra.gmra.mrb[14].mxu1 %vm1096_vm3, %v1370_v23  ;;  %v1914_v23 = vld [vmem:[%s3478_s12 + $0x8] sm:$0xff] }
 0x408   : > { %2549 = vmatprep.mubr.msk.f32.mxu1 %vm2852_vm0, %v2853_v7  ;;  %2548 = vmatpush3.msra.mxu1 %v1520_v51 }
 0x409   : > { %2662 = vmatprep.subr.bf16.mxu1 %v2851_v4 }
 0x4da   : > { %v1596_v35 = vpop.f32.mrb[14].mxu1 }
 0x4db   : > { %v2546_v36 = vpop.f32.mrb[15].mxu1  ;;  %v1600_v37 = vsel %vm1173_vm4, %v1596_v35, -inf }
 0x4dc   : > { %1601 = vmax.xlane.f32.xlu1 %v1600_v37 }
 0x569   : > { %v1602_v40 = vpop.xlane.xlu1 %1601 }
 0x56a   : > { %v1603_v41 = vsub.f32 %v1596_v35, %v1602_v40  ;;  %v2675_v35 = vpack.c.bf16 %v2003_v34, %v2002_v33  ;;  %v2333_v40 = vld [vmem:[%s3476_s10] ss:$0 sm:$0xff] }
 0x56c   : > { %v1604_v42 = vmul.f32 1.442695, %v1603_v41 }
 0x56e   : > { %2747 = vpow2.f32 %v1604_v42  ;;  %v2334_v42 = vld [vmem:[%s3477_s11] ss:$0 sm:$0xff] }
 0x578   : > { %v2748_v46 = vpop.eup %2747 }
 0x579   : > { %v1606_v47 = vsel %vm1173_vm4, %v2748_v46, 0.0 }
 0x57a   : > { %1607 = vadd.xlane.f32.xlu1 %v1606_v47 }
 0x57e   : > { %862 = vadd.xlane.f32.xlu1 %v861_v49 }
 0x607   : > { %v1608_v53 = vpop.xlane.xlu1 %1607 }
 0x608   : > { %2749 = vrcp.f32 %v1608_v53  ;;  %v2337_v53 = vld [vmem:[%s3481_s15] ss:$0 sm:$0xff] }
 0x60b   : > { %v863_v55 = vpop.xlane.xlu1 %862 }
 0x60c   : > { %v871_v56 = vadd.f32 %v2304_v54, %v863_v55 }
 0x60e   : > { %vm872_vm5 = vcmp.gt.f32.partialorder %v871_v56, 0.0 }
 0x60f   : > { %v873_v57 = vsel %vm872_vm5, 1.0, %v2853_v7 }
 0x610   : > { %1876 = vperm.xlu0 %2740, %v873_v57  }
 0x612   : > { %v2750_v58 = vpop.eup %2749 }
 0x613   : > { %v3241_v59 = vmul.f32 %v2750_v58, %v2748_v46  ;;  %v2005_v46 = vld [vmem:[%s3480_s14 + $0x38] sm:$0xff] }
 0x615   : > { %2550 = vmatmul.mubr.msk.f32.vlgmr.msra.gmra.mrb[16].mxu1 %vm1173_vm4, %v3241_v59  ;;  %v1628_v60 = vrot.slane %v3241_v59, 5  ;;  %v1636_v61 = vrot.slane %v3241_v59, 7  ;;  %v1620_v3 = vrot.slane %v3241_v59, 3  ;;  %v1624_v5 = vrot.slane %v3241_v59, 4 }
 0x616   : > { %2574 = vmatprep.mubr.msk.f32.mxu1 %vm2852_vm0, %v2853_v7 }
 0x617   : > { %1629 = vrot.lane.b32.xlu0 %v1628_v60, %s2855_s20  ;;  %v1612_v60 = vrot.slane %v3241_v59, 1 }
 0x61b   : > { %1637 = vrot.lane.b32.xlu0 %v1636_v61, %s2856_s22 }
 0x61f   : > { %1191 = vrot.lane.b32.xlu0 %v1190_v62, %s2857_s5 }
 0x623   : > { %1199 = vrot.lane.b32.xlu0 %v1198_v2, %s2858_s24  ;;  %v1616_v2 = vrot.slane %v3241_v59, 2 }
 0x68f   : > { %v1877_v10 = vpop.permute.xlu0 %1876 }
 0x693   : > { %v1630_v33 = vpop.permute.xlu0 %1629 }
 0x6e8   : > { %v1715_v8 = vpop.f32.mrb[16].mxu1 }
 0x6e9   : > { %v2551_v9 = vpop.f32.mrb[17].mxu1  ;;  %2557 = vmatmul.mubr.msk.f32.vlgmr.msra.gmra.mrb[8].mxu0 %vm1096_vm3, %v1715_v8  ;;  %v1186_v8 = vrot.slane %v3189_v19, 1 }
 0x6ea   : > { %2661 = vmatpush3.bf16.msra.mxu0 %v2660_v6  ;;  %2563 = vmatprep.mubr.msk.f32.mxu0 %vm2852_vm0, %v2853_v7  ;;  %v1632_v6 = vrot.slane %v3241_v59, 6  ;;  %v1194_v9 = vrot.slane %v3189_v19, 3 }
 0x6eb   : > { %2668 = vmatprep.subr.bf16.mxu0 %v2851_v4 }
 0x6f1   : > { %2564 = vmatmul.mubr.msk.f32.vlgmr.msra.gmra.mrb[8].mxu0 %vm1096_vm3, %v3207_v25  ;;  %v1916_v25 = vld [vmem:[%s3478_s12 + $0x18] sm:$0xff] }
 0x6f2   : > { %2593 = vmatprep.mubr.msk.f32.mxu0 %vm2852_vm0, %v2853_v7  ;;  %v1913_v7 = vld [vmem:[%s3478_s12] sm:$0xff]  ;;  %2670 = vmatpush3.bf16.msra.mxu0 %v2669_v30 }
 0x6f3   : > { %v2663_v24 = vpack.c.bf16 %v1914_v23, %v1913_v7  ;;  %2671 = vmatprep.subr.bf16.mxu0 %v2851_v4 }
 0x6f5   : > { %2664 = vmatpush3.bf16.msra.mxu1 %v2663_v24 }
 0x6f6   : > { %2665 = vmatprep.subr.bf16.mxu1 %v2851_v4  ;;  %2673 = vmatpush3.bf16.msra.mxu0 %v2672_v32 }
 0x6f7   : > { %2674 = vmatprep.subr.bf16.mxu0 %v2851_v4 }
 0x6fa   : > { %2676 = vmatpush3.bf16.msra.mxu0 %v2675_v35 }
 0x6fb   : > { %2677 = vmatprep.subr.bf16.mxu0 %v2851_v4  ;;  %v2004_v4 = vld [vmem:[%s3480_s14 + $0x30] sm:$0xff] }
 0x6fc   : > { %v2678_v47 = vpack.c.bf16 %v2005_v46, %v2004_v4 }
 0x6fe   : > { %2679 = vmatpush3.bf16.msra.mxu0 %v2678_v47  ;;  %v2864_v47 = vmov 1966171168  }
 0x7c4   : > { %v1864_v11 = vpop.f32.mrb[8].mxu0 }
 0x7c5   : > { %v1879_v12 = vmul.f32 %v1877_v10, %v1864_v11  ;;  %v2565_v13 = vpop.f32.mrb[9].mxu0 }
 0x7c7   : > { %v1880_v15 = vadd.f32 %v1879_v12, %v3054_v14  ;;  %v1915_v14 = vld [vmem:[%s3478_s12 + $0x10] sm:$0xff] }
 0x7c8   : > { %v2666_v26 = vpack.c.bf16 %v1916_v25, %v1915_v14 }
 0x7c9   : > { %v1883_v16 = vsel %vm615_vm1, %v1880_v15, 0.0 }
 0x7ca   : > { %1884 = vadd.xlane.f32.xlu1 %v1883_v16  ;;  %2667 = vmatpush3.bf16.msra.mxu1 %v2666_v26  ;;  %v2339_v16 = vld [vmem:[%s3482_s16] ss:$0 sm:$0xff] }
 0x857   : > { %v1885_v17 = vpop.xlane.xlu1 %1884 }
 0x858   : > { %v1887_v18 = vmul.f32 0.03125, %v1885_v17 }
 0x85a   : > { %v1888_v20 = vsub.f32 %v1880_v15, %v1887_v18  ;;  %v2340_v18 = vld [vmem:[%s3483_s17] ss:$0 sm:$0xff] }
 0x85c   : > { %v1889_v21 = vmul.f32 %v1888_v20, %v1888_v20 }
 0x85e   : > { %v1890_v22 = vsel %vm615_vm1, %v1889_v21, 0.0 }
 0x85f   : > { %1891 = vadd.xlane.f32.xlu1 %v1890_v22 }
 0x8ec   : > { %v1892_v36 = vpop.xlane.xlu1 %1891 }
 0x8ed   : > { %v1893_v37 = vmul.f32 0.03125, %v1892_v36  ;;  %v1206_v36 = vrot.slane %v3189_v19, 6 }
 0x8ef   : > { %v1894_v38 = vadd.f32 1e-06, %v1893_v37  ;;  %v1202_v37 = vrot.slane %v3189_v19, 5 }
 0x8f1   : > { %2751 = vrsqrt.f32 %v1894_v38 }
 0x8fb   : > { %v2752_v39 = vpop.eup %2751 }
 0x8fc   : > { %v1896_v41 = vmul.f32 %v2752_v39, %v1888_v20  ;;  %v1638_v39 = vpop.permute.xlu0 %1637 }
 0x8fe   : > { %v1903_v43 = vmul.f32 %v2333_v40, %v1896_v41  ;;  %v1210_v40 = vrot.slane %v3189_v19, 7 }
 0x900   : > { %v1910_v44 = vadd.f32 %v2334_v42, %v1903_v43  ;;  %v1192_v42 = vpop.permute.xlu0 %1191 }
 0x902   : > { %vm1911_vm6 = vcmp.ne.f32.partialorder %v1910_v44, %v1910_v44 }
 0x903   : > { %v1912_v45 = vsel %vm1911_vm6, 0.0, %v1910_v44 }
 0x904   : > { %2575 = vmatmul.mubr.msk.f32.vlgmr.msra.gmra.mrb[18].mxu1 %vm615_vm1, %v1912_v45  ;;  %v1200_v44 = vpop.permute.xlu0 %1199 }
 0x9d7   : > { %v1993_v49 = vpop.f32.mrb[18].mxu1 }
 0x9d8   : > { %v1994_v50 = vadd.f32 %v2335_v48, %v1993_v49  ;;  %v2576_v51 = vpop.f32.mrb[19].mxu1  ;;  %v2156_v48 = vunpack.c.l.s4 %v2864_v47  ;;  %v2158_v49 = vlaneseq }
 0x9da   : > { %v1997_v52 = vmax.f32 %v1994_v50, 0.0  ;;  %vm2172_vm13 = vcmp.lt.s32.totalorder %v2158_v49, 256 }
 0x9dc   : > { %2594 = vmatmul.mubr.msk.f32.vlgmr.msra.gmra.mrb[10].mxu0 %vm772_vm2, %v1997_v52  ;;  %v2157_v52 = vunpack.c.0.s8 %v2156_v48 }
 0xaaf   : > { %v2082_v54 = vpop.f32.mrb[10].mxu0 }
 0xab0   : > { %v2083_v55 = vadd.f32 %v2337_v53, %v2082_v54  ;;  %v2595_v56 = vpop.f32.mrb[11].mxu0  ;;  %v2159_v53 = vshrl.u32 %v2158_v49, 7 }
 0xab2   : > { %v2086_v57 = vadd.f32 %v2083_v55, %v1912_v45 }
 0xab4   : > { %v2089_v58 = vsel %vm615_vm1, %v2086_v57, 0.0 }
 0xab5   : > { %2090 = vadd.xlane.f32.xlu1 %v2089_v58 }
 0xac6   : > { %1613 = vrot.lane.b32.xlu1 %v1612_v60, %s2859_s23 }
 0xb42   : > { %v2091_v61 = vpop.xlane.xlu1 %2090 }
 0xb43   : > { %v2092_v62 = vmul.f32 0.03125, %v2091_v61 }
 0xb45   : > { %v2093_v63 = vsub.f32 %v2086_v57, %v2092_v62 }
 0xb46   : > { %v1614_v10 = vpop.permute.xlu1 %1613 }
 0xb47   : > { %v2094_v0 = vmul.f32 %v2093_v63, %v2093_v63  ;;  %v1640_v28 = vsel %vm1173_vm4, %v3241_v59, %v1614_v10 }
 0xb49   : > { %v2095_v1 = vsel %vm615_vm1, %v2094_v0, 0.0 }
 0xb4a   : > { %2096 = vadd.xlane.f32.xlu1 %v2095_v1 }
 0xb5b   : > { %1617 = vrot.lane.b32.xlu1 %v1616_v2, %s2857_s5 }
 0xb5f   : > { %1621 = vrot.lane.b32.xlu1 %v1620_v3, %s2860_s0 }
 0xb63   : > { %1625 = vrot.lane.b32.xlu1 %v1624_v5, %s2858_s24 }
 0xb67   : > { %1633 = vrot.lane.b32.xlu1 %v1632_v6, %s2861_s18 }
 0xb6b   : > { %1187 = vrot.lane.b32.xlu1 %v1186_v8, %s2859_s23 }
 0xb6f   : > { %1195 = vrot.lane.b32.xlu1 %v1194_v9, %s2860_s0 }
 0xbd7   : > { %v2097_v11 = vpop.xlane.xlu1 %2096 }
 0xbd8   : > { %v2098_v12 = vmul.f32 0.03125, %v2097_v11 }
 0xbda   : > { %v2099_v13 = vadd.f32 1e-06, %v2098_v12 }
 0xbdb   : > { %v1618_v20 = vpop.permute.xlu1 %1617 }
 0xbdc   : > { %2753 = vrsqrt.f32 %v2099_v13  ;;  %v1641_v29 = vsel %vm1096_vm3, %v1640_v28, %v1618_v20 }
 0xbdf   : > { %v1622_v23 = vpop.permute.xlu1 %1621 }
 0xbe0   : > { %v1642_v32 = vsel %vm1216_vm8, %v1641_v29, %v1622_v23 }
 0xbe3   : > { %v1626_v27 = vpop.permute.xlu1 %1625 }
 0xbe4   : > { %v1643_v34 = vsel %vm615_vm1, %v1642_v32, %v1626_v27 }
 0xbe5   : > { %v1644_v59 = vsel %vm1219_vm9, %v1643_v34, %v1630_v33 }
 0xbe6   : > { %v2754_v15 = vpop.eup %2753 }
 0xbe7   : > { %v2101_v17 = vmul.f32 %v2754_v15, %v2093_v63  ;;  %v1634_v35 = vpop.permute.xlu1 %1633  ;;  %v2160_v63 = vsub.s32 %v2157_v52, %v2159_v53 }
 0xbe8   : > { %v1645_v38 = vsel %vm1221_vm10, %v1644_v59, %v1634_v35 }
 0xbe9   : > { %v2108_v21 = vmul.f32 %v2339_v16, %v2101_v17  ;;  %v1646_v41 = vsel %vm1223_vm11, %v1645_v38, %v1638_v39 }
 0xbeb   : > { %v2115_v22 = vadd.f32 %v2340_v18, %v2108_v21  ;;  %v1188_v43 = vpop.permute.xlu1 %1187 }
 0xbec   : > { %v1214_v54 = vsel %vm1173_vm4, %v3189_v19, %v1188_v43 }
 0xbed   : > { %vm2116_vm7 = vcmp.ne.f32.partialorder %v2115_v22, %v2115_v22  ;;  %v1215_v58 = vsel %vm1096_vm3, %v1214_v54, %v1192_v42 }
 0xbee   : > { %v2117_v7 = vsel %vm2116_vm7, 0.0, %v2115_v22 }
 0xbef   : > { %v2133_v14 = vrot.slane %v2117_v7, 5  ;;  %v2119_v24 = vrot.slane %v2117_v7, 1  ;;  %v2123_v25 = vrot.slane %v2117_v7, 2  ;;  %v2137_v26 = vrot.slane %v2117_v7, 6  ;;  %v1196_v45 = vpop.permute.xlu1 %1195 }
 0xbf0   : > { %v2141_v30 = vrot.slane %v2117_v7, 7  ;;  %v2127_v31 = vrot.slane %v2117_v7, 3  ;;  %v2131_v55 = vrot.slane %v2117_v7, 4  ;;  %v1217_v19 = vsel %vm1216_vm8, %v1215_v58, %v1196_v45 }
 0xbf1   : > { %2134 = vrot.lane.b32.xlu0 %v2133_v14, %s2858_s24  ;;  %2120 = vrot.lane.b32.xlu1 %v2119_v24, %s2858_s24  ;;  %s2863_s24 = smov 96   ;;  %v1218_v8 = vsel %vm615_vm1, %v1217_v19, %v1200_v44 }
 0xbf5   : > { %2124 = vrot.lane.b32.xlu0 %v2123_v25, %s2862_s1  ;;  %2138 = vrot.lane.b32.xlu1 %v2137_v26, %s2862_s1 }
 0xbf9   : > { %2142 = vrot.lane.b32.xlu0 %v2141_v30, %s2863_s24  ;;  %2128 = vrot.lane.b32.xlu1 %v2127_v31, %s2863_s24 }
 0xbfd   : > { %1207 = vrot.lane.b32.xlu0 %v1206_v36, %s2861_s18  ;;  %1203 = vrot.lane.b32.xlu1 %v1202_v37, %s2855_s20  ;;  %s3368_s20 = sand.u32 1, %s2841_s21  }
 0xbfe   : > { %s2298_s2 = sshll.u32 %s3368_s20, 1  ;;  %s3502_s18 = scalar_lea.vmem [#allocation5], %s3368_s20 }
 0xbff   : > { %s599_s28 = scalar_lea.vmem [#allocation3], %s2298_s2  ;;  %s2207_s5 = sshll.u32 %s3502_s18, 4  ;;  %s3399_s5 = int_to_ptr.vmem [resolvable:$true] %s2207_s5 }
 0xc00   : > { %s2194_s29 = sshll.u32 %s599_s28, 4  ;;  %s3530_s2 = sld [smem:[#allocation23_spill]]  ;;  %s3391_s29 = int_to_ptr.vmem [resolvable:$true] %s2194_s29 }
 0xc01   : > { %1211 = vrot.lane.b32.xlu1 %v1210_v40, %s2856_s22  ;;  %1869 = vrot.lane.b32.xlu0 %v1646_v41, %s2862_s1  ;;  %s3527_s22 = sld [smem:[#allocation12_spill]]  ;;  %s2755_s19 = scalar_lea.vmem %s3391_s29, 32 }
 0xc02   : > { %p2756_p11 = scmp.ne.s32.totalorder %s3391_s29, %s2755_s19  ;;  %p2762_p0 = scmp.lt.s32.totalorder %s3391_s29, %s2760_s3 }
 0xc03   : > { %p2763_p1 = scmp.lt.s32.totalorder %s2761_s4, %s2755_s19 }
 0xc04   : > { %p2757_p12 = pnand %p2756_p11, %p3008_p5 }
 0xc05   : > { %p2764_p2 = por %p2763_p1, %p2762_p0 }
 0xc06   : > { %p2758_p13 = pneg %p2757_p12 }
 0xc07   : > { %s2347_s25 = sshll.u32 %s3527_s22, 5  ;;  %s2344_s23 = sshll.u32 %s3527_s22, 4 }
 0xc08   : > { %s3389_s1 = scalar_lea.hbm %s3529_s30, %s2347_s25  ;;  %s3397_s18 = scalar_lea.hbm %s3530_s2, %s2344_s23 }
 0xc09   : > { %s2176_s25 = scalar_lea.sflag [#allocation4], %s3368_s20  ;;  %p2765_p3 = pnand %p2764_p2, %p2758_p13 }
 0xc63   : > { %v2135_v4 = vpop.permute.xlu0 %2134  ;;  %v2121_v46 = vpop.permute.xlu1 %2120 }
 0xc64   : > { %v2149_v56 = vsel %vm615_vm1, %v2131_v55, %v2135_v4  ;;  %v2145_v57 = vsel %vm615_vm1, %v2117_v7, %v2121_v46 }
 0xc67   : > { %v2125_v50 = vpop.permute.xlu0 %2124  ;;  %v2139_v51 = vpop.permute.xlu1 %2138 }
 0xc68   : > { %v2146_v60 = vsel %vm772_vm2, %v2145_v57, %v2125_v50  ;;  %v2150_v61 = vsel %vm772_vm2, %v2149_v56, %v2139_v51 }
 0xc6b   : > { %v2143_v62 = vpop.permute.xlu0 %2142  ;;  %v2129_v0 = vpop.permute.xlu1 %2128 }
 0xc6c   : > { %v2151_v1 = vsel %vm2147_vm12, %v2150_v61, %v2143_v62  ;;  %v2148_v2 = vsel %vm2147_vm12, %v2146_v60, %v2129_v0 }
 0xc6d   : > { %v2154_v3 = vcombine.low %v2148_v2, %v2151_v1 }
 0xc6f   : > { %v2161_v5 = vrot.slane %v2154_v3, %v2160_v63  ;;  %v1208_v6 = vpop.permute.xlu0 %1207  ;;  %v1204_v9 = vpop.permute.xlu1 %1203 }
 0xc70   : > { %v1220_v10 = vsel %vm1219_vm9, %v1218_v8, %v1204_v9 }
 0xc71   : > { %v2168_v11 = vrot.slane %v2161_v5, %v2160_v63  ;;  %v1222_v13 = vsel %vm1221_vm10, %v1220_v10, %v1208_v6 }
 0xc73   : > { %v1870_v12 = vpop.permute.xlu0 %1869  ;;  %v1212_v15 = vpop.permute.xlu1 %1211  ;;  %2174 = vst.msk [vmem:[%s599_s28] sm:$0x3] %vm2172_vm13, %v2168_v11 }
 0xc74   : > { %v1224_v16 = vsel %vm1223_vm11, %v1222_v13, %v1212_v15 }
 0xc75   : > { %2768 = shalt.err (!%p2765_p3)
}
 0xc76   : > { %s2769_s28 = scalar_lea.hbm %s3389_s1, 32  ;;  %s2773_s22 = scalar_lea.hbm %s3529_s30, 64 }
 0xc77   : > { %p2770_p4 = scmp.ne.s32.totalorder %s3389_s1, %s2769_s28  ;;  %p2774_p9 = scmp.lt.u32.totalorder %s3389_s1, %s3529_s30 }
 0xc78   : > { %p2775_p10 = scmp.lt.u32.totalorder %s2773_s22, %s2769_s28  ;;  %p2777_p12 = scmp.lt.u32.totalorder %s2769_s28, %s3389_s1 }
 0xc79   : > { %p2771_p7 = pnand %p2770_p4, %p3008_p5 }
 0xc7a   : > { %p2776_p11 = por %p2775_p10, %p2774_p9 }
 0xc7b   : > { %p2772_p8 = pneg %p2771_p7 }
 0xc7c   : > { %p2778_p13 = por %p2777_p12, %p2776_p11 }
 0xc7e   : > { %p2779_p0 = pnand %p2778_p13, %p2772_p8 }
 0xc80   : > { %2782 = shalt.err (!%p2779_p0)
}
 0xc81   : > { %2682 = dma.vmem_to_hbm [thread:$0]  (%p3008_p5), %s3391_s29, 32, %s3389_s1, %s2176_s25   ;;  %v1872_v17 = vsel %vm772_vm2, %v1224_v16, %v1870_v12 }
 0xc82   : > { %s3531_s4 = scalar_lea.vmem [#allocation5], %s3368_s20  ;;  %s2181_s19 = scalar_lea.sflag [#allocation6], %s3368_s20 }
 0xc83   : > { %1873 = vst [vmem:[%s3531_s4] sm:$0x1] %v1872_v17  ;;  %s2783_s28 = scalar_lea.vmem %s3399_s5, 16  ;;  %s2866_s23 = smov [#allocation5]  }
 0xc84   : > { %p2784_p1 = scmp.ne.s32.totalorder %s3399_s5, %s2783_s28  ;;  %s2787_s24 = sshll.u32 %s2866_s23, 4  ;;  %s2788_s24 = int_to_ptr.vmem [resolvable:$false] %s2787_s24 }
 0xc85   : > { %s2789_s22 = scalar_lea.vmem %s2788_s24, 32  ;;  %p2790_p4 = scmp.lt.s32.totalorder %s3399_s5, %s2788_s24 }
 0xc86   : > { %p2785_p2 = pnand %p2784_p1, %p3008_p5  ;;  %p2791_p7 = scmp.lt.s32.totalorder %s2789_s22, %s2783_s28 }
 0xc88   : > { %p2786_p3 = pneg %p2785_p2  ;;  %p2792_p8 = por %p2791_p7, %p2790_p4 }
 0xc8a   : > { %p2793_p9 = pnand %p2792_p8, %p2786_p3 }
 0xc8c   : > { %2796 = shalt.err (!%p2793_p9)
}
 0xc8d   : > { %s2797_s20 = scalar_lea.hbm %s3397_s18, 16  ;;  %s2801_s25 = scalar_lea.hbm %s3530_s2, 32 }
 0xc8e   : > { %p2798_p10 = scmp.ne.s32.totalorder %s3397_s18, %s2797_s20  ;;  %p2802_p13 = scmp.lt.u32.totalorder %s3397_s18, %s3530_s2 }
 0xc8f   : > { %p2803_p0 = scmp.lt.u32.totalorder %s2801_s25, %s2797_s20  ;;  %p2805_p2 = scmp.lt.u32.totalorder %s2797_s20, %s3397_s18 }
 0xc90   : > { %p2799_p11 = pnand %p2798_p10, %p3008_p5 }
 0xc91   : > { %p2804_p1 = por %p2803_p0, %p2802_p13 }
 0xc92   : > { %p2800_p12 = pneg %p2799_p11 }
 0xc93   : > { %p2806_p3 = por %p2805_p2, %p2804_p1 }
 0xc95   : > { %p2807_p4 = pnand %p2806_p3, %p2800_p12 }
 0xc97   : > { %2810 = shalt.err (!%p2807_p4)
}
 0xc98   : > { %2683 = dma.vmem_to_hbm [thread:$0]  (%p3008_p5), %s3399_s5, 16, %s3397_s18, %s2181_s19  }
 0xc99 PF: > { %s3532_s4 = sld [smem:[#allocation11_spill]]  ;;  %s3533_s28 = sld [smem:[#allocation9_spill]] }
 0xc9f   : > { %p2693_p7 = scmp.ge.s32.totalorder %s3532_s4, 2  ;;  %s2219_s24 = sand.u32 1, %s3533_s28  }
 0xca0   : > { %s2220_s22 = scalar_lea.sflag [#allocation4], %s2219_s24 }
 0xca1   : > { %p2687_p8 = pnand %p2693_p7, %p3012_p6 }
 0xca3   : > { %2828 = dma.done.wait (!%p2687_p8), %s2220_s22, 32  }
 0xca4   : > { %2830 = vsyncadd (!%p2687_p8), %s2220_s22, 4294967264  ;;  %s2229_s20 = scalar_lea.sflag [#allocation6], %s2219_s24 }
 0xca5   : > { %2832 = dma.done.wait (!%p2687_p8), %s2229_s20, 16  }
 0xca6   : > { %2834 = vsyncadd (!%p2687_p8), %s2229_s20, 4294967280  ;;  %s3535_s22 = sld [smem:[#allocation13_spill]]  ;;  %s3536_s0 = sld [smem:[#allocation10_spill]] }
 0xca7   : > { %s3537_s1 = sld [smem:[#allocation14_spill]]  ;;  %s3538_s20 = smov %s2841_s21 }
 0xcac   : > { %p35_p5 = scmp.ge.s32.totalorder %s3535_s22, 4   ;;  %s3539_s21 = smov %s3536_s0 }
 0xcae   :  { %37 = sbr.rel (!%p35_p5) target bundleno = 13 (0xd), region = 148 }
 0xcb5   :  { %2233 = vsyncpa [#allocation4], 1 }
 0xcb6   :  { %2235 = vsyncpa [#allocation4 + $0x1], 1 }
 0xcb7   :  { %2236 = vsyncpa [#allocation6], 1 }
 0xcb8   :  { %2238 = vsyncpa [#allocation6 + $0x1], 1 }

</bundles_post_ra>
